<compile_context>
chip_gen: v7x
topology: tpu7x:2x2x1
jax: 0.10.0
libtpu: 0.0.40
codegen_flags: <defaults>
</compile_context>

<pallas_src>
import functools
import math

import jax
import jax.numpy as jnp
from jax.experimental import pallas as pl
from jax.experimental.pallas import tpu as pltpu


def _round_up(v, m):
    return (v + m - 1) // m * m


# ------------------------------------------------------------------ weight slab

def _slab_layout(cin, cout, mid, depth, growth, num_blocks):
    """Static row offsets of every conv inside the packed weight slab.

    Slab shape: (rows, Cmax + 1).  A conv1x1 (Co, Ci) occupies Co rows,
    columns [0:Ci]; its bias sits in column Cmax of the same rows.  A conv3x3
    occupies 9*growth rows (9 stacked (growth, Ci) blocks, one per (kh, kw)
    tap); its bias sits in column Cmax of the first `growth` rows.  Every
    entry is aligned to 8 rows so in-kernel slices stay sublane-aligned.
    """
    Cmax = mid + depth * growth
    off = 0

    def alloc(rows):
        nonlocal off
        o = off
        off += _round_up(rows, 8)
        return o

    w_in = alloc(mid)
    blocks = []
    for _ in range(num_blocks):
        layers = []
        for d in range(depth):
            C = mid + d * growth
            o1 = alloc(C)            # conv1x1  C -> C
            o3 = alloc(9 * growth)   # conv3x3  C -> growth
            layers.append((o1, o3, C))
        oo = alloc(mid)              # block-final conv1x1  Cmax -> mid
        blocks.append((tuple(layers), oo))
    w_out = alloc(cout)
    return {"w_in": w_in, "blocks": tuple(blocks), "w_out": w_out,
            "rows": off, "Cmax": Cmax}


def _pack_slab(params, layout, dtype):
    """Pack every weight/bias into one lane-dense (rows, Cmax+1) slab."""
    Cmax = layout["Cmax"]
    slab = jnp.zeros((layout["rows"], Cmax + 1), jnp.float32)

    def put1x1(s, off, w, b):                      # w: (Co, Ci), b: (Co,)
        co, ci = w.shape
        s = s.at[off:off + co, 0:ci].set(w)
        return s.at[off:off + co, Cmax].set(b)

    def put3x3(s, off, w, b):                      # w: (Co, Ci, 3, 3), b: (Co,)
        co, ci = w.shape[0], w.shape[1]
        w9 = jnp.transpose(w, (2, 3, 0, 1)).reshape(9 * co, ci)
        s = s.at[off:off + 9 * co, 0:ci].set(w9)
        return s.at[off:off + co, Cmax].set(b)

    slab = put1x1(slab, layout["w_in"], params["w_in"], params["b_in"])
    for (layers, oo), bp in zip(layout["blocks"], params["blocks"]):
        for (o1, o3, _), lp in zip(layers, bp["layers"]):
            slab = put1x1(slab, o1, lp["w1"], lp["b1"])
            slab = put3x3(slab, o3, lp["w3"], lp["b3"])
        slab = put1x1(slab, oo, bp["wout"], bp["bout"])
    slab = put1x1(slab, layout["w_out"], params["w_out"], params["b_out"])
    return slab.astype(dtype)


# ------------------------------------------------------------------ kernel

def _densenet_kernel(x_ref, w_ref, o_ref, buf_ref, pad_ref, *,
                     H, W, cin, cout, mid, growth, layout):
    """Fused DenseNet forward for one batch element (grid over N).

    Channel-major / lane-dense: activations are (C, HW) f32 values, the concat
    buffer is a (Cmax, HW) VMEM scratch, and conv3x3 reads shifted slices of a
    flat zero-padded (Cmax, PAD + HW + PAD) VMEM scratch.
    """
    f32 = jnp.float32
    HW = H * W
    Cmax = layout["Cmax"]
    BC = Cmax                      # bias column inside the weight slab
    PAD = _round_up(W + 1, 128)    # pad width -> interior starts lane-aligned
    cdt = w_ref.dtype              # matmul operand dtype (bf16 or f32)

    # Zero only the border strips ever read as conv3x3 zero padding
    # (<= W+1 columns per side).  Done unconditionally every grid step.
    z = jnp.zeros((Cmax, W + 1), dtype=pad_ref.dtype)
    pad_ref[:, PAD - (W + 1):PAD] = z
    pad_ref[:, PAD + HW:PAD + HW + (W + 1)] = z

    # Column masks killing horizontally out-of-bounds conv3x3 taps; vertical
    # out-of-bounds taps land in the zeroed border strips above.
    pcol = jax.lax.broadcasted_iota(jnp.int32, (1, HW), 1)
    xcol = jax.lax.rem(pcol, jnp.int32(W))
    m_left = jnp.broadcast_to((xcol != 0).astype(f32), (growth, HW))       # dx = -1
    m_right = jnp.broadcast_to((xcol != W - 1).astype(f32), (growth, HW))  # dx = +1

    def conv1x1(off, ci, co, rhs):
        w = w_ref[off:off + co, 0:ci]                            # (co, ci)
        b = w_ref[off:off + co, BC:BC + 1].astype(f32)           # (co, 1)
        return jnp.dot(w, rhs.astype(cdt), preferred_element_type=f32) + b

    # ---- input 1x1 conv ----------------------------------------------------
    h = conv1x1(layout["w_in"], cin, mid, x_ref[0])              # (mid, HW) f32

    # ---- residual dense blocks ----------------------------------------------
    # TODO(synk): loops are Python-unrolled; for deep configs switch to a
    # fori_loop / extra grid axis with C padded to Cmax to bound code size.
    for layers, off_out in layout["blocks"]:
        buf_ref[0:mid, :] = h
        for off1, off3, C in layers:
            cur = buf_ref[0:C, :]                                # (C, HW) f32

            # conv1x1 -> ReLU
            a = jnp.maximum(conv1x1(off1, C, C, cur), 0.0)

            # Write activation into the lane-aligned interior of the padded
            # scratch.  Rows [C:Cmax] may hold stale data from earlier layers
            # but are never read (reads below touch rows [0:C] only).
            pad_ref[0:C, PAD:PAD + HW] = a.astype(pad_ref.dtype)

            # conv3x3 = 9 accumulating (growth, C) x (C, HW) dots over shifted
            # slices of the padded scratch (no im2col concat, no (HW,9C) blob).
            b3 = w_ref[off3:off3 + growth, BC:BC + 1].astype(f32)
            acc = None
            for k in range(9):
                kh, kw = divmod(k, 3)
                s = (kh - 1) * W + (kw - 1)
                w3k = w_ref[off3 + k * growth:off3 + (k + 1) * growth, 0:C]
                piece = pad_ref[0:C, PAD + s:PAD + s + HW]
                contrib = jnp.dot(w3k, piece, preferred_element_type=f32)
                if kw == 0:
                    contrib = contrib * m_left
                elif kw == 2:
                    contrib = contrib * m_right
                acc = contrib if acc is None else acc + contrib
            g = jnp.maximum(acc + b3, 0.0)                       # (growth, HW)

            # concat([x, g], channel) == full-row write into the VMEM buffer
            buf_ref[C:C + growth, :] = g

        # Block-final 1x1 conv fused with the residual add; the block input is
        # re-read from buf rows [0:mid] (written at block start, never
        # overwritten) so it is not kept live across the whole block.
        h = conv1x1(off_out, Cmax, mid, buf_ref[0:Cmax, :]) + buf_ref[0:mid, :]

    # ---- output 1x1 conv; result is already channel-major (cout, HW) ---------
    y = conv1x1(layout["w_out"], mid, cout, h)
    o_ref[0] = y.astype(o_ref.dtype)


# ------------------------------------------------------------------ wrapper

def densenet_apply(x_nchw, params, compute_dtype=jnp.bfloat16):
    """Run the fused DenseNet Pallas kernel on an NCHW input."""
    N, cin, H, W = x_nchw.shape
    HW = H * W
    mid = params["w_in"].shape[0]
    cout = params["w_out"].shape[0]
    num_blocks = len(params["blocks"])
    depth = len(params["blocks"][0]["layers"])
    growth = params["blocks"][0]["layers"][0]["w3"].shape[0]

    layout = _slab_layout(cin, cout, mid, depth, growth, num_blocks)
    Cmax = layout["Cmax"]
    slab = _pack_slab(params, layout, compute_dtype)

    # NCHW -> (N, cin, H*W): metadata-only reshape; channel-major, lane-dense.
    x_flat = x_nchw.reshape(N, cin, HW)
    padw = _round_up(W + 1, 128)

    kernel = functools.partial(
        _densenet_kernel, H=H, W=W, cin=cin, cout=cout, mid=mid,
        growth=growth, layout=layout)

    # Explicit VMEM budget (review: re-derive per generation; v7x has 64 MiB).
    def vmem_bytes(shape, dtype):
        lead = math.prod(shape[:-2]) if len(shape) > 2 else 1
        return (lead * _round_up(shape[-2], 8) * _round_up(shape[-1], 128)
                * jnp.dtype(dtype).itemsize)

    est = (vmem_bytes((Cmax, HW), jnp.float32)                    # concat buffer
           + vmem_bytes((Cmax, 2 * padw + HW), compute_dtype)     # padded scratch
           + 2 * vmem_bytes((1, cin, HW), x_nchw.dtype)           # x (dbl-buffer)
           + 2 * vmem_bytes((1, cout, HW), x_nchw.dtype)          # out (dbl-buffer)
           + 2 * vmem_bytes(slab.shape, compute_dtype))           # weight slab
    vmem_limit = int(min(64 * 2 ** 20, max(8 * 2 ** 20, 2 * est)))

    # TODO(synk): for N == 1 (or very large per-step work) add batch blocking /
    # an HW row-tile grid axis so both v7x TensorCores get a parallel step.
    out = pl.pallas_call(
        kernel,
        out_shape=jax.ShapeDtypeStruct((N, cout, HW), x_nchw.dtype),
        grid=(N,),
        in_specs=[
            pl.BlockSpec((1, cin, HW), lambda n: (n, 0, 0)),
            pl.BlockSpec(slab.shape, lambda n: (0, 0)),   # one slab, fetched once
        ],
        out_specs=pl.BlockSpec((1, cout, HW), lambda n: (n, 0, 0)),
        scratch_shapes=[
            pltpu.VMEM((Cmax, HW), jnp.float32),                  # concat buffer
            pltpu.VMEM((Cmax, 2 * padw + HW), compute_dtype),     # padded conv3x3 in
        ],
        compiler_params=pltpu.CompilerParams(
            dimension_semantics=("parallel",),
            vmem_limit_bytes=vmem_limit),
    )(x_flat, slab)

    return out.reshape(N, cout, H, W)                             # already NCHW


# ------------------------------------------------------------------ params

def _uniform(key, shape, bound):
    return jax.random.uniform(key, shape, jnp.float32, -bound, bound)


def init_conv1x1(key, cin, cout):
    k1, k2 = jax.random.split(key)
    bound = 1.0 / math.sqrt(cin)                     # PyTorch Conv2d default
    return _uniform(k1, (cout, cin), bound), _uniform(k2, (cout,), bound)


def init_conv3x3(key, cin, cout):
    k1, k2 = jax.random.split(key)
    bound = 1.0 / math.sqrt(cin * 9)
    return _uniform(k1, (cout, cin, 3, 3), bound), _uniform(k2, (cout,), bound)


def init_densenet(key, in_channels, out_channels, num_blocks, mid_channels,
                  depth, growth, zero_init=False):
    keys = jax.random.split(key, 2 + num_blocks)
    params = {}
    params["w_in"], params["b_in"] = init_conv1x1(keys[0], in_channels, mid_channels)
    blocks = []
    for b in range(num_blocks):
        bkeys = jax.random.split(keys[2 + b], depth + 1)
        layers = []
        for d in range(depth):
            c = mid_channels + d * growth
            lk1, lk2 = jax.random.split(bkeys[d])
            w1, b1 = init_conv1x1(lk1, c, c)
            w3, b3 = init_conv3x3(lk2, c, growth)
            layers.append({"w1": w1, "b1": b1, "w3": w3, "b3": b3})
        wout, bout = init_conv1x1(bkeys[depth],
                                  mid_channels + depth * growth, mid_channels)
        blocks.append({"layers": layers, "wout": wout, "bout": bout})
    params["blocks"] = blocks
    w_out, b_out = init_conv1x1(keys[1], mid_channels, out_channels)
    if zero_init:
        w_out, b_out = jnp.zeros_like(w_out), jnp.zeros_like(b_out)
    params["w_out"], params["b_out"] = w_out, b_out
    return params


# ------------------------------------------------------------------ reference

def ref_densenet(x_nchw, params):
    """Pure-JAX (lax.conv, NCHW/OIHW) reference mirroring the PyTorch forward."""
    dn = ("NCHW", "OIHW", "NCHW")
    prec = jax.lax.Precision.HIGHEST

    def c1(h, w, b):
        return (jax.lax.conv_general_dilated(
            h, w[:, :, None, None], (1, 1), "VALID",
            dimension_numbers=dn, precision=prec)
            + b[None, :, None, None])

    def c3(h, w, b):
        return (jax.lax.conv_general_dilated(
            h, w, (1, 1), "SAME", dimension_numbers=dn, precision=prec)
            + b[None, :, None, None])

    h = c1(x_nchw, params["w_in"], params["b_in"])
    for bp in params["blocks"]:
        hin = h
        hh = hin
        for lp in bp["layers"]:
            a = jax.nn.relu(c1(hh, lp["w1"], lp["b1"]))
            g = jax.nn.relu(c3(a, lp["w3"], lp["b3"]))
            hh = jnp.concatenate([hh, g], axis=1)
        h = hin + c1(hh, bp["wout"], bp["bout"])
    return c1(h, params["w_out"], params["b_out"])


# ------------------------------------------------------------------ main

if __name__ == "__main__":
    in_channels, out_channels = 4, 4
    num_blocks, mid_channels, depth, growth = 2, 8, 2, 4

    key = jax.random.PRNGKey(0)
    kx, kp = jax.random.split(key)
    x = jax.random.normal(kx, (2, in_channels, 16, 16), jnp.float32)   # NCHW
    params = init_densenet(kp, in_channels, out_channels, num_blocks,
                           mid_channels, depth, growth, zero_init=False)

    ref = jax.block_until_ready(ref_densenet(x, params))

    # f32 matmul operands: tight numerical check of the kernel algorithm.
    out_f32 = jax.block_until_ready(
        jax.jit(functools.partial(densenet_apply, compute_dtype=jnp.float32))(
            x, params))
    assert out_f32.shape == (2, out_channels, 16, 16), out_f32.shape
    assert jnp.allclose(out_f32, ref, rtol=1e-3, atol=1e-3), float(
        jnp.max(jnp.abs(out_f32 - ref)))

    # bf16 matmul operands (default perf config), f32 accumulation: loose check.
    out_bf16 = jax.block_until_ready(jax.jit(densenet_apply)(x, params))
    assert out_bf16.shape == (2, out_channels, 16, 16), out_bf16.shape
    assert jnp.allclose(out_bf16, ref, rtol=1e-1, atol=1e-1), float(
        jnp.max(jnp.abs(out_bf16 - ref)))

    print("KERNEL_OK")
</pallas_src>

<mosaic_0001>
module attributes {stable_mosaic.version = 11 : i64} {
  func.func @_densenet_kernel(%arg0: i32, %arg1: memref<1x4x256xf32, #tpu.memory_space<vmem>>, %arg2: memref<240x17xf32, #tpu.memory_space<vmem>>, %arg3: memref<1x4x256xf32, #tpu.memory_space<vmem>>, %arg4: memref<16x256xf32, #tpu.memory_space<vmem>>, %arg5: memref<16x512xf32, #tpu.memory_space<vmem>>) attributes {dimension_semantics = [#tpu.dimension_semantics<parallel>], iteration_bounds = array<i64: 2>, scalar_prefetch = 0 : i64, scratch_operands = 2 : i64, tpu.core_type = #tpu.core_type<tc>, window_params = [{transform_indices = @transform_0, window_bounds = array<i64: 1, 4, 256>}, {pipeline_mode = #tpu.pipeline_mode<synchronous>, transform_indices = @transform_1, window_bounds = array<i64: 240, 17>}, {transform_indices = @transform_2, window_bounds = array<i64: 1, 4, 256>}]} {
    %cst = arith.constant 0.000000e+00 : f32
    %0 = vector.broadcast %cst : f32 to vector<16x17xf32>
    %c0 = arith.constant 0 : index
    %c111 = arith.constant 111 : index
    %1 = vector.load %arg5[%c0, %c111] : memref<16x512xf32, #tpu.memory_space<vmem>>, vector<16x17xf32>
    tpu.vector_store %arg5[%c0, %c111], %0 {strides = array<i32>} : memref<16x512xf32, #tpu.memory_space<vmem>>, vector<16x17xf32>,
    %c0_0 = arith.constant 0 : index
    %c384 = arith.constant 384 : index
    %2 = vector.load %arg5[%c0_0, %c384] : memref<16x512xf32, #tpu.memory_space<vmem>>, vector<16x17xf32>
    tpu.vector_store %arg5[%c0_0, %c384], %0 {strides = array<i32>} : memref<16x512xf32, #tpu.memory_space<vmem>>, vector<16x17xf32>,
    %3 = tpu.iota {dimensions = array<i32: 1>} : vector<1x256xi32>
    %c16_i32 = arith.constant 16 : i32
    %4 = vector.broadcast %c16_i32 : i32 to vector<1x256xi32>
    %5 = arith.remsi %3, %4 : vector<1x256xi32>
    %c0_i32 = arith.constant 0 : i32
    %6 = vector.broadcast %c0_i32 : i32 to vector<1x256xi32>
    %7 = arith.cmpi ne, %5, %6 : vector<1x256xi32>
    %8 = arith.extui %7 : vector<1x256xi1> to vector<1x256xi32>
    %9 = arith.sitofp %8 : vector<1x256xi32> to vector<1x256xf32>
    %10 = vector.shape_cast %9 : vector<1x256xf32> to vector<1x256xf32>
    %11 = vector.broadcast %10 : vector<1x256xf32> to vector<4x256xf32>
    %c15_i32 = arith.constant 15 : i32
    %12 = vector.broadcast %c15_i32 : i32 to vector<1x256xi32>
    %13 = arith.cmpi ne, %5, %12 : vector<1x256xi32>
    %14 = arith.extui %13 : vector<1x256xi1> to vector<1x256xi32>
    %15 = arith.sitofp %14 : vector<1x256xi32> to vector<1x256xf32>
    %16 = vector.shape_cast %15 : vector<1x256xf32> to vector<1x256xf32>
    %17 = vector.broadcast %16 : vector<1x256xf32> to vector<4x256xf32>
    %c0_1 = arith.constant 0 : index
    %c0_2 = arith.constant 0 : index
    %c0_3 = arith.constant 0 : index
    %18 = vector.load %arg1[%c0_1, %c0_2, %c0_3] : memref<1x4x256xf32, #tpu.memory_space<vmem>>, vector<1x4x256xf32>
    %19 = vector.shape_cast %18 : vector<1x4x256xf32> to vector<4x256xf32>
    %c0_4 = arith.constant 0 : index
    %c0_5 = arith.constant 0 : index
    %20 = vector.load %arg2[%c0_4, %c0_5] : memref<240x17xf32, #tpu.memory_space<vmem>>, vector<8x4xf32>
    %c0_6 = arith.constant 0 : index
    %c16 = arith.constant 16 : index
    %21 = vector.load %arg2[%c0_6, %c16] : memref<240x17xf32, #tpu.memory_space<vmem>>, vector<8x1xf32>
    %cst_7 = arith.constant dense<0.000000e+00> : vector<8x256xf32>
    %22 = tpu.matmul %20, %19, %cst_7 {dimension_numbers = #tpu.dot_dimension_numbers<[1], [0], [0], [1], [0, 0, 1, 1], [], []>} : vector<8x4xf32>, vector<4x256xf32>, vector<8x256xf32> -> vector<8x256xf32>
    %23 = vector.broadcast %21 : vector<8x1xf32> to vector<8x256xf32>
    %24 = arith.addf %22, %23 : vector<8x256xf32>
    %c0_8 = arith.constant 0 : index
    %c0_9 = arith.constant 0 : index
    %25 = vector.load %arg4[%c0_8, %c0_9] : memref<16x256xf32, #tpu.memory_space<vmem>>, vector<8x256xf32>
    tpu.vector_store %arg4[%c0_8, %c0_9], %24 {strides = array<i32>} : memref<16x256xf32, #tpu.memory_space<vmem>>, vector<8x256xf32>,
    %c0_10 = arith.constant 0 : index
    %c0_11 = arith.constant 0 : index
    %26 = vector.load %arg4[%c0_10, %c0_11] : memref<16x256xf32, #tpu.memory_space<vmem>>, vector<8x256xf32>
    %c8 = arith.constant 8 : index
    %c0_12 = arith.constant 0 : index
    %27 = vector.load %arg2[%c8, %c0_12] : memref<240x17xf32, #tpu.memory_space<vmem>>, vector<8x8xf32>
    %c8_13 = arith.constant 8 : index
    %c16_14 = arith.constant 16 : index
    %28 = vector.load %arg2[%c8_13, %c16_14] : memref<240x17xf32, #tpu.memory_space<vmem>>, vector<8x1xf32>
    %cst_15 = arith.constant dense<0.000000e+00> : vector<8x256xf32>
    %29 = tpu.matmul %27, %26, %cst_15 {dimension_numbers = #tpu.dot_dimension_numbers<[1], [0], [0], [1], [0, 0, 1, 1], [], []>} : vector<8x8xf32>, vector<8x256xf32>, vector<8x256xf32> -> vector<8x256xf32>
    %30 = vector.broadcast %28 : vector<8x1xf32> to vector<8x256xf32>
    %31 = arith.addf %29, %30 : vector<8x256xf32>
    %cst_16 = arith.constant 0.000000e+00 : f32
    %32 = vector.broadcast %cst_16 : f32 to vector<8x256xf32>
    %33 = arith.maximumf %31, %32 : vector<8x256xf32>
    %c0_17 = arith.constant 0 : index
    %c128 = arith.constant 128 : index
    %34 = vector.load %arg5[%c0_17, %c128] : memref<16x512xf32, #tpu.memory_space<vmem>>, vector<8x256xf32>
    tpu.vector_store %arg5[%c0_17, %c128], %33 {strides = array<i32>} : memref<16x512xf32, #tpu.memory_space<vmem>>, vector<8x256xf32>,
    %c16_18 = arith.constant 16 : index
    %c16_19 = arith.constant 16 : index
    %35 = vector.load %arg2[%c16_18, %c16_19] : memref<240x17xf32, #tpu.memory_space<vmem>>, vector<4x1xf32>
    %c16_20 = arith.constant 16 : index
    %c0_21 = arith.constant 0 : index
    %36 = vector.load %arg2[%c16_20, %c0_21] : memref<240x17xf32, #tpu.memory_space<vmem>>, vector<4x8xf32>
    %c0_22 = arith.constant 0 : index
    %c111_23 = arith.constant 111 : index
    %37 = vector.load %arg5[%c0_22, %c111_23] : memref<16x512xf32, #tpu.memory_space<vmem>>, vector<8x256xf32>
    %cst_24 = arith.constant dense<0.000000e+00> : vector<4x256xf32>
    %38 = tpu.matmul %36, %37, %cst_24 {dimension_numbers = #tpu.dot_dimension_numbers<[1], [0], [0], [1], [0, 0, 1, 1], [], []>} : vector<4x8xf32>, vector<8x256xf32>, vector<4x256xf32> -> vector<4x256xf32>
    %39 = arith.mulf %38, %11 : vector<4x256xf32>
    %c20 = arith.constant 20 : index
    %c0_25 = arith.constant 0 : index
    %40 = vector.load %arg2[%c20, %c0_25] : memref<240x17xf32, #tpu.memory_space<vmem>>, vector<4x8xf32>
    %c0_26 = arith.constant 0 : index
    %c112 = arith.constant 112 : index
    %41 = vector.load %arg5[%c0_26, %c112] : memref<16x512xf32, #tpu.memory_space<vmem>>, vector<8x256xf32>
    %cst_27 = arith.constant dense<0.000000e+00> : vector<4x256xf32>
    %42 = tpu.matmul %40, %41, %cst_27 {dimension_numbers = #tpu.dot_dimension_numbers<[1], [0], [0], [1], [0, 0, 1, 1], [], []>} : vector<4x8xf32>, vector<8x256xf32>, vector<4x256xf32> -> vector<4x256xf32>
    %43 = arith.addf %39, %42 : vector<4x256xf32>
    %c24 = arith.constant 24 : index
    %c0_28 = arith.constant 0 : index
    %44 = vector.load %arg2[%c24, %c0_28] : memref<240x17xf32, #tpu.memory_space<vmem>>, vector<4x8xf32>
    %c0_29 = arith.constant 0 : index
    %c113 = arith.constant 113 : index
    %45 = vector.load %arg5[%c0_29, %c113] : memref<16x512xf32, #tpu.memory_space<vmem>>, vector<8x256xf32>
    %cst_30 = arith.constant dense<0.000000e+00> : vector<4x256xf32>
    %46 = tpu.matmul %44, %45, %cst_30 {dimension_numbers = #tpu.dot_dimension_numbers<[1], [0], [0], [1], [0, 0, 1, 1], [], []>} : vector<4x8xf32>, vector<8x256xf32>, vector<4x256xf32> -> vector<4x256xf32>
    %47 = arith.mulf %46, %17 : vector<4x256xf32>
    %48 = arith.addf %43, %47 : vector<4x256xf32>
    %c28 = arith.constant 28 : index
    %c0_31 = arith.constant 0 : index
    %49 = vector.load %arg2[%c28, %c0_31] : memref<240x17xf32, #tpu.memory_space<vmem>>, vector<4x8xf32>
    %c0_32 = arith.constant 0 : index
    %c127 = arith.constant 127 : index
    %50 = vector.load %arg5[%c0_32, %c127] : memref<16x512xf32, #tpu.memory_space<vmem>>, vector<8x256xf32>
    %cst_33 = arith.constant dense<0.000000e+00> : vector<4x256xf32>
    %51 = tpu.matmul %49, %50, %cst_33 {dimension_numbers = #tpu.dot_dimension_numbers<[1], [0], [0], [1], [0, 0, 1, 1], [], []>} : vector<4x8xf32>, vector<8x256xf32>, vector<4x256xf32> -> vector<4x256xf32>
    %52 = arith.mulf %51, %11 : vector<4x256xf32>
    %53 = arith.addf %48, %52 : vector<4x256xf32>
    %c32 = arith.constant 32 : index
    %c0_34 = arith.constant 0 : index
    %54 = vector.load %arg2[%c32, %c0_34] : memref<240x17xf32, #tpu.memory_space<vmem>>, vector<4x8xf32>
    %c0_35 = arith.constant 0 : index
    %c128_36 = arith.constant 128 : index
    %55 = vector.load %arg5[%c0_35, %c128_36] : memref<16x512xf32, #tpu.memory_space<vmem>>, vector<8x256xf32>
    %cst_37 = arith.constant dense<0.000000e+00> : vector<4x256xf32>
    %56 = tpu.matmul %54, %55, %cst_37 {dimension_numbers = #tpu.dot_dimension_numbers<[1], [0], [0], [1], [0, 0, 1, 1], [], []>} : vector<4x8xf32>, vector<8x256xf32>, vector<4x256xf32> -> vector<4x256xf32>
    %57 = arith.addf %53, %56 : vector<4x256xf32>
    %c36 = arith.constant 36 : index
    %c0_38 = arith.constant 0 : index
    %58 = vector.load %arg2[%c36, %c0_38] : memref<240x17xf32, #tpu.memory_space<vmem>>, vector<4x8xf32>
    %c0_39 = arith.constant 0 : index
    %c129 = arith.constant 129 : index
    %59 = vector.load %arg5[%c0_39, %c129] : memref<16x512xf32, #tpu.memory_space<vmem>>, vector<8x256xf32>
    %cst_40 = arith.constant dense<0.000000e+00> : vector<4x256xf32>
    %60 = tpu.matmul %58, %59, %cst_40 {dimension_numbers = #tpu.dot_dimension_numbers<[1], [0], [0], [1], [0, 0, 1, 1], [], []>} : vector<4x8xf32>, vector<8x256xf32>, vector<4x256xf32> -> vector<4x256xf32>
    %61 = arith.mulf %60, %17 : vector<4x256xf32>
    %62 = arith.addf %57, %61 : vector<4x256xf32>
    %c40 = arith.constant 40 : index
    %c0_41 = arith.constant 0 : index
    %63 = vector.load %arg2[%c40, %c0_41] : memref<240x17xf32, #tpu.memory_space<vmem>>, vector<4x8xf32>
    %c0_42 = arith.constant 0 : index
    %c143 = arith.constant 143 : index
    %64 = vector.load %arg5[%c0_42, %c143] : memref<16x512xf32, #tpu.memory_space<vmem>>, vector<8x256xf32>
    %cst_43 = arith.constant dense<0.000000e+00> : vector<4x256xf32>
    %65 = tpu.matmul %63, %64, %cst_43 {dimension_numbers = #tpu.dot_dimension_numbers<[1], [0], [0], [1], [0, 0, 1, 1], [], []>} : vector<4x8xf32>, vector<8x256xf32>, vector<4x256xf32> -> vector<4x256xf32>
    %66 = arith.mulf %65, %11 : vector<4x256xf32>
    %67 = arith.addf %62, %66 : vector<4x256xf32>
    %c44 = arith.constant 44 : index
    %c0_44 = arith.constant 0 : index
    %68 = vector.load %arg2[%c44, %c0_44] : memref<240x17xf32, #tpu.memory_space<vmem>>, vector<4x8xf32>
    %c0_45 = arith.constant 0 : index
    %c144 = arith.constant 144 : index
    %69 = vector.load %arg5[%c0_45, %c144] : memref<16x512xf32, #tpu.memory_space<vmem>>, vector<8x256xf32>
    %cst_46 = arith.constant dense<0.000000e+00> : vector<4x256xf32>
    %70 = tpu.matmul %68, %69, %cst_46 {dimension_numbers = #tpu.dot_dimension_numbers<[1], [0], [0], [1], [0, 0, 1, 1], [], []>} : vector<4x8xf32>, vector<8x256xf32>, vector<4x256xf32> -> vector<4x256xf32>
    %71 = arith.addf %67, %70 : vector<4x256xf32>
    %c48 = arith.constant 48 : index
    %c0_47 = arith.constant 0 : index
    %72 = vector.load %arg2[%c48, %c0_47] : memref<240x17xf32, #tpu.memory_space<vmem>>, vector<4x8xf32>
    %c0_48 = arith.constant 0 : index
    %c145 = arith.constant 145 : index
    %73 = vector.load %arg5[%c0_48, %c145] : memref<16x512xf32, #tpu.memory_space<vmem>>, vector<8x256xf32>
    %cst_49 = arith.constant dense<0.000000e+00> : vector<4x256xf32>
    %74 = tpu.matmul %72, %73, %cst_49 {dimension_numbers = #tpu.dot_dimension_numbers<[1], [0], [0], [1], [0, 0, 1, 1], [], []>} : vector<4x8xf32>, vector<8x256xf32>, vector<4x256xf32> -> vector<4x256xf32>
    %75 = arith.mulf %74, %17 : vector<4x256xf32>
    %76 = arith.addf %71, %75 : vector<4x256xf32>
    %77 = vector.broadcast %35 : vector<4x1xf32> to vector<4x256xf32>
    %78 = arith.addf %76, %77 : vector<4x256xf32>
    %cst_50 = arith.constant 0.000000e+00 : f32
    %79 = vector.broadcast %cst_50 : f32 to vector<4x256xf32>
    %80 = arith.maximumf %78, %79 : vector<4x256xf32>
    %c8_51 = arith.constant 8 : index
    %c0_52 = arith.constant 0 : index
    %81 = vector.load %arg4[%c8_51, %c0_52] : memref<16x256xf32, #tpu.memory_space<vmem>>, vector<4x256xf32>
    tpu.vector_store %arg4[%c8_51, %c0_52], %80 {strides = array<i32>} : memref<16x256xf32, #tpu.memory_space<vmem>>, vector<4x256xf32>,
    %c0_53 = arith.constant 0 : index
    %c0_54 = arith.constant 0 : index
    %82 = vector.load %arg4[%c0_53, %c0_54] : memref<16x256xf32, #tpu.memory_space<vmem>>, vector<12x256xf32>
    %c56 = arith.constant 56 : index
    %c0_55 = arith.constant 0 : index
    %83 = vector.load %arg2[%c56, %c0_55] : memref<240x17xf32, #tpu.memory_space<vmem>>, vector<12x12xf32>
    %c56_56 = arith.constant 56 : index
    %c16_57 = arith.constant 16 : index
    %84 = vector.load %arg2[%c56_56, %c16_57] : memref<240x17xf32, #tpu.memory_space<vmem>>, vector<12x1xf32>
    %cst_58 = arith.constant dense<0.000000e+00> : vector<12x256xf32>
    %85 = tpu.matmul %83, %82, %cst_58 {dimension_numbers = #tpu.dot_dimension_numbers<[1], [0], [0], [1], [0, 0, 1, 1], [], []>} : vector<12x12xf32>, vector<12x256xf32>, vector<12x256xf32> -> vector<12x256xf32>
    %86 = vector.broadcast %84 : vector<12x1xf32> to vector<12x256xf32>
    %87 = arith.addf %85, %86 : vector<12x256xf32>
    %cst_59 = arith.constant 0.000000e+00 : f32
    %88 = vector.broadcast %cst_59 : f32 to vector<12x256xf32>
    %89 = arith.maximumf %87, %88 : vector<12x256xf32>
    %c0_60 = arith.constant 0 : index
    %c128_61 = arith.constant 128 : index
    %90 = vector.load %arg5[%c0_60, %c128_61] : memref<16x512xf32, #tpu.memory_space<vmem>>, vector<12x256xf32>
    tpu.vector_store %arg5[%c0_60, %c128_61], %89 {strides = array<i32>} : memref<16x512xf32, #tpu.memory_space<vmem>>, vector<12x256xf32>,
    %c72 = arith.constant 72 : index
    %c16_62 = arith.constant 16 : index
    %91 = vector.load %arg2[%c72, %c16_62] : memref<240x17xf32, #tpu.memory_space<vmem>>, vector<4x1xf32>
    %c72_63 = arith.constant 72 : index
    %c0_64 = arith.constant 0 : index
    %92 = vector.load %arg2[%c72_63, %c0_64] : memref<240x17xf32, #tpu.memory_space<vmem>>, vector<4x12xf32>
    %c0_65 = arith.constant 0 : index
    %c111_66 = arith.constant 111 : index
    %93 = vector.load %arg5[%c0_65, %c111_66] : memref<16x512xf32, #tpu.memory_space<vmem>>, vector<12x256xf32>
    %cst_67 = arith.constant dense<0.000000e+00> : vector<4x256xf32>
    %94 = tpu.matmul %92, %93, %cst_67 {dimension_numbers = #tpu.dot_dimension_numbers<[1], [0], [0], [1], [0, 0, 1, 1], [], []>} : vector<4x12xf32>, vector<12x256xf32>, vector<4x256xf32> -> vector<4x256xf32>
    %95 = arith.mulf %94, %11 : vector<4x256xf32>
    %c76 = arith.constant 76 : index
    %c0_68 = arith.constant 0 : index
    %96 = vector.load %arg2[%c76, %c0_68] : memref<240x17xf32, #tpu.memory_space<vmem>>, vector<4x12xf32>
    %c0_69 = arith.constant 0 : index
    %c112_70 = arith.constant 112 : index
    %97 = vector.load %arg5[%c0_69, %c112_70] : memref<16x512xf32, #tpu.memory_space<vmem>>, vector<12x256xf32>
    %cst_71 = arith.constant dense<0.000000e+00> : vector<4x256xf32>
    %98 = tpu.matmul %96, %97, %cst_71 {dimension_numbers = #tpu.dot_dimension_numbers<[1], [0], [0], [1], [0, 0, 1, 1], [], []>} : vector<4x12xf32>, vector<12x256xf32>, vector<4x256xf32> -> vector<4x256xf32>
    %99 = arith.addf %95, %98 : vector<4x256xf32>
    %c80 = arith.constant 80 : index
    %c0_72 = arith.constant 0 : index
    %100 = vector.load %arg2[%c80, %c0_72] : memref<240x17xf32, #tpu.memory_space<vmem>>, vector<4x12xf32>
    %c0_73 = arith.constant 0 : index
    %c113_74 = arith.constant 113 : index
    %101 = vector.load %arg5[%c0_73, %c113_74] : memref<16x512xf32, #tpu.memory_space<vmem>>, vector<12x256xf32>
    %cst_75 = arith.constant dense<0.000000e+00> : vector<4x256xf32>
    %102 = tpu.matmul %100, %101, %cst_75 {dimension_numbers = #tpu.dot_dimension_numbers<[1], [0], [0], [1], [0, 0, 1, 1], [], []>} : vector<4x12xf32>, vector<12x256xf32>, vector<4x256xf32> -> vector<4x256xf32>
    %103 = arith.mulf %102, %17 : vector<4x256xf32>
    %104 = arith.addf %99, %103 : vector<4x256xf32>
    %c84 = arith.constant 84 : index
    %c0_76 = arith.constant 0 : index
    %105 = vector.load %arg2[%c84, %c0_76] : memref<240x17xf32, #tpu.memory_space<vmem>>, vector<4x12xf32>
    %c0_77 = arith.constant 0 : index
    %c127_78 = arith.constant 127 : index
    %106 = vector.load %arg5[%c0_77, %c127_78] : memref<16x512xf32, #tpu.memory_space<vmem>>, vector<12x256xf32>
    %cst_79 = arith.constant dense<0.000000e+00> : vector<4x256xf32>
    %107 = tpu.matmul %105, %106, %cst_79 {dimension_numbers = #tpu.dot_dimension_numbers<[1], [0], [0], [1], [0, 0, 1, 1], [], []>} : vector<4x12xf32>, vector<12x256xf32>, vector<4x256xf32> -> vector<4x256xf32>
    %108 = arith.mulf %107, %11 : vector<4x256xf32>
    %109 = arith.addf %104, %108 : vector<4x256xf32>
    %c88 = arith.constant 88 : index
    %c0_80 = arith.constant 0 : index
    %110 = vector.load %arg2[%c88, %c0_80] : memref<240x17xf32, #tpu.memory_space<vmem>>, vector<4x12xf32>
    %c0_81 = arith.constant 0 : index
    %c128_82 = arith.constant 128 : index
    %111 = vector.load %arg5[%c0_81, %c128_82] : memref<16x512xf32, #tpu.memory_space<vmem>>, vector<12x256xf32>
    %cst_83 = arith.constant dense<0.000000e+00> : vector<4x256xf32>
    %112 = tpu.matmul %110, %111, %cst_83 {dimension_numbers = #tpu.dot_dimension_numbers<[1], [0], [0], [1], [0, 0, 1, 1], [], []>} : vector<4x12xf32>, vector<12x256xf32>, vector<4x256xf32> -> vector<4x256xf32>
    %113 = arith.addf %109, %112 : vector<4x256xf32>
    %c92 = arith.constant 92 : index
    %c0_84 = arith.constant 0 : index
    %114 = vector.load %arg2[%c92, %c0_84] : memref<240x17xf32, #tpu.memory_space<vmem>>, vector<4x12xf32>
    %c0_85 = arith.constant 0 : index
    %c129_86 = arith.constant 129 : index
    %115 = vector.load %arg5[%c0_85, %c129_86] : memref<16x512xf32, #tpu.memory_space<vmem>>, vector<12x256xf32>
    %cst_87 = arith.constant dense<0.000000e+00> : vector<4x256xf32>
    %116 = tpu.matmul %114, %115, %cst_87 {dimension_numbers = #tpu.dot_dimension_numbers<[1], [0], [0], [1], [0, 0, 1, 1], [], []>} : vector<4x12xf32>, vector<12x256xf32>, vector<4x256xf32> -> vector<4x256xf32>
    %117 = arith.mulf %116, %17 : vector<4x256xf32>
    %118 = arith.addf %113, %117 : vector<4x256xf32>
    %c96 = arith.constant 96 : index
    %c0_88 = arith.constant 0 : index
    %119 = vector.load %arg2[%c96, %c0_88] : memref<240x17xf32, #tpu.memory_space<vmem>>, vector<4x12xf32>
    %c0_89 = arith.constant 0 : index
    %c143_90 = arith.constant 143 : index
    %120 = vector.load %arg5[%c0_89, %c143_90] : memref<16x512xf32, #tpu.memory_space<vmem>>, vector<12x256xf32>
    %cst_91 = arith.constant dense<0.000000e+00> : vector<4x256xf32>
    %121 = tpu.matmul %119, %120, %cst_91 {dimension_numbers = #tpu.dot_dimension_numbers<[1], [0], [0], [1], [0, 0, 1, 1], [], []>} : vector<4x12xf32>, vector<12x256xf32>, vector<4x256xf32> -> vector<4x256xf32>
    %122 = arith.mulf %121, %11 : vector<4x256xf32>
    %123 = arith.addf %118, %122 : vector<4x256xf32>
    %c100 = arith.constant 100 : index
    %c0_92 = arith.constant 0 : index
    %124 = vector.load %arg2[%c100, %c0_92] : memref<240x17xf32, #tpu.memory_space<vmem>>, vector<4x12xf32>
    %c0_93 = arith.constant 0 : index
    %c144_94 = arith.constant 144 : index
    %125 = vector.load %arg5[%c0_93, %c144_94] : memref<16x512xf32, #tpu.memory_space<vmem>>, vector<12x256xf32>
    %cst_95 = arith.constant dense<0.000000e+00> : vector<4x256xf32>
    %126 = tpu.matmul %124, %125, %cst_95 {dimension_numbers = #tpu.dot_dimension_numbers<[1], [0], [0], [1], [0, 0, 1, 1], [], []>} : vector<4x12xf32>, vector<12x256xf32>, vector<4x256xf32> -> vector<4x256xf32>
    %127 = arith.addf %123, %126 : vector<4x256xf32>
    %c104 = arith.constant 104 : index
    %c0_96 = arith.constant 0 : index
    %128 = vector.load %arg2[%c104, %c0_96] : memref<240x17xf32, #tpu.memory_space<vmem>>, vector<4x12xf32>
    %c0_97 = arith.constant 0 : index
    %c145_98 = arith.constant 145 : index
    %129 = vector.load %arg5[%c0_97, %c145_98] : memref<16x512xf32, #tpu.memory_space<vmem>>, vector<12x256xf32>
    %cst_99 = arith.constant dense<0.000000e+00> : vector<4x256xf32>
    %130 = tpu.matmul %128, %129, %cst_99 {dimension_numbers = #tpu.dot_dimension_numbers<[1], [0], [0], [1], [0, 0, 1, 1], [], []>} : vector<4x12xf32>, vector<12x256xf32>, vector<4x256xf32> -> vector<4x256xf32>
    %131 = arith.mulf %130, %17 : vector<4x256xf32>
    %132 = arith.addf %127, %131 : vector<4x256xf32>
    %133 = vector.broadcast %91 : vector<4x1xf32> to vector<4x256xf32>
    %134 = arith.addf %132, %133 : vector<4x256xf32>
    %cst_100 = arith.constant 0.000000e+00 : f32
    %135 = vector.broadcast %cst_100 : f32 to vector<4x256xf32>
    %136 = arith.maximumf %134, %135 : vector<4x256xf32>
    %c12 = arith.constant 12 : index
    %c0_101 = arith.constant 0 : index
    %137 = vector.load %arg4[%c12, %c0_101] : memref<16x256xf32, #tpu.memory_space<vmem>>, vector<4x256xf32>
    tpu.vector_store %arg4[%c12, %c0_101], %136 {strides = array<i32>} : memref<16x256xf32, #tpu.memory_space<vmem>>, vector<4x256xf32>,
    %c0_102 = arith.constant 0 : index
    %c0_103 = arith.constant 0 : index
    %138 = vector.load %arg4[%c0_102, %c0_103] : memref<16x256xf32, #tpu.memory_space<vmem>>, vector<16x256xf32>
    %c112_104 = arith.constant 112 : index
    %c0_105 = arith.constant 0 : index
    %139 = vector.load %arg2[%c112_104, %c0_105] : memref<240x17xf32, #tpu.memory_space<vmem>>, vector<8x16xf32>
    %c112_106 = arith.constant 112 : index
    %c16_107 = arith.constant 16 : index
    %140 = vector.load %arg2[%c112_106, %c16_107] : memref<240x17xf32, #tpu.memory_space<vmem>>, vector<8x1xf32>
    %cst_108 = arith.constant dense<0.000000e+00> : vector<8x256xf32>
    %141 = tpu.matmul %139, %138, %cst_108 {dimension_numbers = #tpu.dot_dimension_numbers<[1], [0], [0], [1], [0, 0, 1, 1], [], []>} : vector<8x16xf32>, vector<16x256xf32>, vector<8x256xf32> -> vector<8x256xf32>
    %142 = vector.broadcast %140 : vector<8x1xf32> to vector<8x256xf32>
    %143 = arith.addf %141, %142 : vector<8x256xf32>
    %c0_109 = arith.constant 0 : index
    %c0_110 = arith.constant 0 : index
    %144 = vector.load %arg4[%c0_109, %c0_110] : memref<16x256xf32, #tpu.memory_space<vmem>>, vector<8x256xf32>
    %145 = arith.addf %143, %144 : vector<8x256xf32>
    %c0_111 = arith.constant 0 : index
    %c0_112 = arith.constant 0 : index
    %146 = vector.load %arg4[%c0_111, %c0_112] : memref<16x256xf32, #tpu.memory_space<vmem>>, vector<8x256xf32>
    tpu.vector_store %arg4[%c0_111, %c0_112], %145 {strides = array<i32>} : memref<16x256xf32, #tpu.memory_space<vmem>>, vector<8x256xf32>,
    %c0_113 = arith.constant 0 : index
    %c0_114 = arith.constant 0 : index
    %147 = vector.load %arg4[%c0_113, %c0_114] : memref<16x256xf32, #tpu.memory_space<vmem>>, vector<8x256xf32>
    %c120 = arith.constant 120 : index
    %c0_115 = arith.constant 0 : index
    %148 = vector.load %arg2[%c120, %c0_115] : memref<240x17xf32, #tpu.memory_space<vmem>>, vector<8x8xf32>
    %c120_116 = arith.constant 120 : index
    %c16_117 = arith.constant 16 : index
    %149 = vector.load %arg2[%c120_116, %c16_117] : memref<240x17xf32, #tpu.memory_space<vmem>>, vector<8x1xf32>
    %cst_118 = arith.constant dense<0.000000e+00> : vector<8x256xf32>
    %150 = tpu.matmul %148, %147, %cst_118 {dimension_numbers = #tpu.dot_dimension_numbers<[1], [0], [0], [1], [0, 0, 1, 1], [], []>} : vector<8x8xf32>, vector<8x256xf32>, vector<8x256xf32> -> vector<8x256xf32>
    %151 = vector.broadcast %149 : vector<8x1xf32> to vector<8x256xf32>
    %152 = arith.addf %150, %151 : vector<8x256xf32>
    %cst_119 = arith.constant 0.000000e+00 : f32
    %153 = vector.broadcast %cst_119 : f32 to vector<8x256xf32>
    %154 = arith.maximumf %152, %153 : vector<8x256xf32>
    %c0_120 = arith.constant 0 : index
    %c128_121 = arith.constant 128 : index
    %155 = vector.load %arg5[%c0_120, %c128_121] : memref<16x512xf32, #tpu.memory_space<vmem>>, vector<8x256xf32>
    tpu.vector_store %arg5[%c0_120, %c128_121], %154 {strides = array<i32>} : memref<16x512xf32, #tpu.memory_space<vmem>>, vector<8x256xf32>,
    %c128_122 = arith.constant 128 : index
    %c16_123 = arith.constant 16 : index
    %156 = vector.load %arg2[%c128_122, %c16_123] : memref<240x17xf32, #tpu.memory_space<vmem>>, vector<4x1xf32>
    %c128_124 = arith.constant 128 : index
    %c0_125 = arith.constant 0 : index
    %157 = vector.load %arg2[%c128_124, %c0_125] : memref<240x17xf32, #tpu.memory_space<vmem>>, vector<4x8xf32>
    %c0_126 = arith.constant 0 : index
    %c111_127 = arith.constant 111 : index
    %158 = vector.load %arg5[%c0_126, %c111_127] : memref<16x512xf32, #tpu.memory_space<vmem>>, vector<8x256xf32>
    %cst_128 = arith.constant dense<0.000000e+00> : vector<4x256xf32>
    %159 = tpu.matmul %157, %158, %cst_128 {dimension_numbers = #tpu.dot_dimension_numbers<[1], [0], [0], [1], [0, 0, 1, 1], [], []>} : vector<4x8xf32>, vector<8x256xf32>, vector<4x256xf32> -> vector<4x256xf32>
    %160 = arith.mulf %159, %11 : vector<4x256xf32>
    %c132 = arith.constant 132 : index
    %c0_129 = arith.constant 0 : index
    %161 = vector.load %arg2[%c132, %c0_129] : memref<240x17xf32, #tpu.memory_space<vmem>>, vector<4x8xf32>
    %c0_130 = arith.constant 0 : index
    %c112_131 = arith.constant 112 : index
    %162 = vector.load %arg5[%c0_130, %c112_131] : memref<16x512xf32, #tpu.memory_space<vmem>>, vector<8x256xf32>
    %cst_132 = arith.constant dense<0.000000e+00> : vector<4x256xf32>
    %163 = tpu.matmul %161, %162, %cst_132 {dimension_numbers = #tpu.dot_dimension_numbers<[1], [0], [0], [1], [0, 0, 1, 1], [], []>} : vector<4x8xf32>, vector<8x256xf32>, vector<4x256xf32> -> vector<4x256xf32>
    %164 = arith.addf %160, %163 : vector<4x256xf32>
    %c136 = arith.constant 136 : index
    %c0_133 = arith.constant 0 : index
    %165 = vector.load %arg2[%c136, %c0_133] : memref<240x17xf32, #tpu.memory_space<vmem>>, vector<4x8xf32>
    %c0_134 = arith.constant 0 : index
    %c113_135 = arith.constant 113 : index
    %166 = vector.load %arg5[%c0_134, %c113_135] : memref<16x512xf32, #tpu.memory_space<vmem>>, vector<8x256xf32>
    %cst_136 = arith.constant dense<0.000000e+00> : vector<4x256xf32>
    %167 = tpu.matmul %165, %166, %cst_136 {dimension_numbers = #tpu.dot_dimension_numbers<[1], [0], [0], [1], [0, 0, 1, 1], [], []>} : vector<4x8xf32>, vector<8x256xf32>, vector<4x256xf32> -> vector<4x256xf32>
    %168 = arith.mulf %167, %17 : vector<4x256xf32>
    %169 = arith.addf %164, %168 : vector<4x256xf32>
    %c140 = arith.constant 140 : index
    %c0_137 = arith.constant 0 : index
    %170 = vector.load %arg2[%c140, %c0_137] : memref<240x17xf32, #tpu.memory_space<vmem>>, vector<4x8xf32>
    %c0_138 = arith.constant 0 : index
    %c127_139 = arith.constant 127 : index
    %171 = vector.load %arg5[%c0_138, %c127_139] : memref<16x512xf32, #tpu.memory_space<vmem>>, vector<8x256xf32>
    %cst_140 = arith.constant dense<0.000000e+00> : vector<4x256xf32>
    %172 = tpu.matmul %170, %171, %cst_140 {dimension_numbers = #tpu.dot_dimension_numbers<[1], [0], [0], [1], [0, 0, 1, 1], [], []>} : vector<4x8xf32>, vector<8x256xf32>, vector<4x256xf32> -> vector<4x256xf32>
    %173 = arith.mulf %172, %11 : vector<4x256xf32>
    %174 = arith.addf %169, %173 : vector<4x256xf32>
    %c144_141 = arith.constant 144 : index
    %c0_142 = arith.constant 0 : index
    %175 = vector.load %arg2[%c144_141, %c0_142] : memref<240x17xf32, #tpu.memory_space<vmem>>, vector<4x8xf32>
    %c0_143 = arith.constant 0 : index
    %c128_144 = arith.constant 128 : index
    %176 = vector.load %arg5[%c0_143, %c128_144] : memref<16x512xf32, #tpu.memory_space<vmem>>, vector<8x256xf32>
    %cst_145 = arith.constant dense<0.000000e+00> : vector<4x256xf32>
    %177 = tpu.matmul %175, %176, %cst_145 {dimension_numbers = #tpu.dot_dimension_numbers<[1], [0], [0], [1], [0, 0, 1, 1], [], []>} : vector<4x8xf32>, vector<8x256xf32>, vector<4x256xf32> -> vector<4x256xf32>
    %178 = arith.addf %174, %177 : vector<4x256xf32>
    %c148 = arith.constant 148 : index
    %c0_146 = arith.constant 0 : index
    %179 = vector.load %arg2[%c148, %c0_146] : memref<240x17xf32, #tpu.memory_space<vmem>>, vector<4x8xf32>
    %c0_147 = arith.constant 0 : index
    %c129_148 = arith.constant 129 : index
    %180 = vector.load %arg5[%c0_147, %c129_148] : memref<16x512xf32, #tpu.memory_space<vmem>>, vector<8x256xf32>
    %cst_149 = arith.constant dense<0.000000e+00> : vector<4x256xf32>
    %181 = tpu.matmul %179, %180, %cst_149 {dimension_numbers = #tpu.dot_dimension_numbers<[1], [0], [0], [1], [0, 0, 1, 1], [], []>} : vector<4x8xf32>, vector<8x256xf32>, vector<4x256xf32> -> vector<4x256xf32>
    %182 = arith.mulf %181, %17 : vector<4x256xf32>
    %183 = arith.addf %178, %182 : vector<4x256xf32>
    %c152 = arith.constant 152 : index
    %c0_150 = arith.constant 0 : index
    %184 = vector.load %arg2[%c152, %c0_150] : memref<240x17xf32, #tpu.memory_space<vmem>>, vector<4x8xf32>
    %c0_151 = arith.constant 0 : index
    %c143_152 = arith.constant 143 : index
    %185 = vector.load %arg5[%c0_151, %c143_152] : memref<16x512xf32, #tpu.memory_space<vmem>>, vector<8x256xf32>
    %cst_153 = arith.constant dense<0.000000e+00> : vector<4x256xf32>
    %186 = tpu.matmul %184, %185, %cst_153 {dimension_numbers = #tpu.dot_dimension_numbers<[1], [0], [0], [1], [0, 0, 1, 1], [], []>} : vector<4x8xf32>, vector<8x256xf32>, vector<4x256xf32> -> vector<4x256xf32>
    %187 = arith.mulf %186, %11 : vector<4x256xf32>
    %188 = arith.addf %183, %187 : vector<4x256xf32>
    %c156 = arith.constant 156 : index
    %c0_154 = arith.constant 0 : index
    %189 = vector.load %arg2[%c156, %c0_154] : memref<240x17xf32, #tpu.memory_space<vmem>>, vector<4x8xf32>
    %c0_155 = arith.constant 0 : index
    %c144_156 = arith.constant 144 : index
    %190 = vector.load %arg5[%c0_155, %c144_156] : memref<16x512xf32, #tpu.memory_space<vmem>>, vector<8x256xf32>
    %cst_157 = arith.constant dense<0.000000e+00> : vector<4x256xf32>
    %191 = tpu.matmul %189, %190, %cst_157 {dimension_numbers = #tpu.dot_dimension_numbers<[1], [0], [0], [1], [0, 0, 1, 1], [], []>} : vector<4x8xf32>, vector<8x256xf32>, vector<4x256xf32> -> vector<4x256xf32>
    %192 = arith.addf %188, %191 : vector<4x256xf32>
    %c160 = arith.constant 160 : index
    %c0_158 = arith.constant 0 : index
    %193 = vector.load %arg2[%c160, %c0_158] : memref<240x17xf32, #tpu.memory_space<vmem>>, vector<4x8xf32>
    %c0_159 = arith.constant 0 : index
    %c145_160 = arith.constant 145 : index
    %194 = vector.load %arg5[%c0_159, %c145_160] : memref<16x512xf32, #tpu.memory_space<vmem>>, vector<8x256xf32>
    %cst_161 = arith.constant dense<0.000000e+00> : vector<4x256xf32>
    %195 = tpu.matmul %193, %194, %cst_161 {dimension_numbers = #tpu.dot_dimension_numbers<[1], [0], [0], [1], [0, 0, 1, 1], [], []>} : vector<4x8xf32>, vector<8x256xf32>, vector<4x256xf32> -> vector<4x256xf32>
    %196 = arith.mulf %195, %17 : vector<4x256xf32>
    %197 = arith.addf %192, %196 : vector<4x256xf32>
    %198 = vector.broadcast %156 : vector<4x1xf32> to vector<4x256xf32>
    %199 = arith.addf %197, %198 : vector<4x256xf32>
    %cst_162 = arith.constant 0.000000e+00 : f32
    %200 = vector.broadcast %cst_162 : f32 to vector<4x256xf32>
    %201 = arith.maximumf %199, %200 : vector<4x256xf32>
    %c8_163 = arith.constant 8 : index
    %c0_164 = arith.constant 0 : index
    %202 = vector.load %arg4[%c8_163, %c0_164] : memref<16x256xf32, #tpu.memory_space<vmem>>, vector<4x256xf32>
    tpu.vector_store %arg4[%c8_163, %c0_164], %201 {strides = array<i32>} : memref<16x256xf32, #tpu.memory_space<vmem>>, vector<4x256xf32>,
    %c0_165 = arith.constant 0 : index
    %c0_166 = arith.constant 0 : index
    %203 = vector.load %arg4[%c0_165, %c0_166] : memref<16x256xf32, #tpu.memory_space<vmem>>, vector<12x256xf32>
    %c168 = arith.constant 168 : index
    %c0_167 = arith.constant 0 : index
    %204 = vector.load %arg2[%c168, %c0_167] : memref<240x17xf32, #tpu.memory_space<vmem>>, vector<12x12xf32>
    %c168_168 = arith.constant 168 : index
    %c16_169 = arith.constant 16 : index
    %205 = vector.load %arg2[%c168_168, %c16_169] : memref<240x17xf32, #tpu.memory_space<vmem>>, vector<12x1xf32>
    %cst_170 = arith.constant dense<0.000000e+00> : vector<12x256xf32>
    %206 = tpu.matmul %204, %203, %cst_170 {dimension_numbers = #tpu.dot_dimension_numbers<[1], [0], [0], [1], [0, 0, 1, 1], [], []>} : vector<12x12xf32>, vector<12x256xf32>, vector<12x256xf32> -> vector<12x256xf32>
    %207 = vector.broadcast %205 : vector<12x1xf32> to vector<12x256xf32>
    %208 = arith.addf %206, %207 : vector<12x256xf32>
    %cst_171 = arith.constant 0.000000e+00 : f32
    %209 = vector.broadcast %cst_171 : f32 to vector<12x256xf32>
    %210 = arith.maximumf %208, %209 : vector<12x256xf32>
    %c0_172 = arith.constant 0 : index
    %c128_173 = arith.constant 128 : index
    %211 = vector.load %arg5[%c0_172, %c128_173] : memref<16x512xf32, #tpu.memory_space<vmem>>, vector<12x256xf32>
    tpu.vector_store %arg5[%c0_172, %c128_173], %210 {strides = array<i32>} : memref<16x512xf32, #tpu.memory_space<vmem>>, vector<12x256xf32>,
    %c184 = arith.constant 184 : index
    %c16_174 = arith.constant 16 : index
    %212 = vector.load %arg2[%c184, %c16_174] : memref<240x17xf32, #tpu.memory_space<vmem>>, vector<4x1xf32>
    %c184_175 = arith.constant 184 : index
    %c0_176 = arith.constant 0 : index
    %213 = vector.load %arg2[%c184_175, %c0_176] : memref<240x17xf32, #tpu.memory_space<vmem>>, vector<4x12xf32>
    %c0_177 = arith.constant 0 : index
    %c111_178 = arith.constant 111 : index
    %214 = vector.load %arg5[%c0_177, %c111_178] : memref<16x512xf32, #tpu.memory_space<vmem>>, vector<12x256xf32>
    %cst_179 = arith.constant dense<0.000000e+00> : vector<4x256xf32>
    %215 = tpu.matmul %213, %214, %cst_179 {dimension_numbers = #tpu.dot_dimension_numbers<[1], [0], [0], [1], [0, 0, 1, 1], [], []>} : vector<4x12xf32>, vector<12x256xf32>, vector<4x256xf32> -> vector<4x256xf32>
    %216 = arith.mulf %215, %11 : vector<4x256xf32>
    %c188 = arith.constant 188 : index
    %c0_180 = arith.constant 0 : index
    %217 = vector.load %arg2[%c188, %c0_180] : memref<240x17xf32, #tpu.memory_space<vmem>>, vector<4x12xf32>
    %c0_181 = arith.constant 0 : index
    %c112_182 = arith.constant 112 : index
    %218 = vector.load %arg5[%c0_181, %c112_182] : memref<16x512xf32, #tpu.memory_space<vmem>>, vector<12x256xf32>
    %cst_183 = arith.constant dense<0.000000e+00> : vector<4x256xf32>
    %219 = tpu.matmul %217, %218, %cst_183 {dimension_numbers = #tpu.dot_dimension_numbers<[1], [0], [0], [1], [0, 0, 1, 1], [], []>} : vector<4x12xf32>, vector<12x256xf32>, vector<4x256xf32> -> vector<4x256xf32>
    %220 = arith.addf %216, %219 : vector<4x256xf32>
    %c192 = arith.constant 192 : index
    %c0_184 = arith.constant 0 : index
    %221 = vector.load %arg2[%c192, %c0_184] : memref<240x17xf32, #tpu.memory_space<vmem>>, vector<4x12xf32>
    %c0_185 = arith.constant 0 : index
    %c113_186 = arith.constant 113 : index
    %222 = vector.load %arg5[%c0_185, %c113_186] : memref<16x512xf32, #tpu.memory_space<vmem>>, vector<12x256xf32>
    %cst_187 = arith.constant dense<0.000000e+00> : vector<4x256xf32>
    %223 = tpu.matmul %221, %222, %cst_187 {dimension_numbers = #tpu.dot_dimension_numbers<[1], [0], [0], [1], [0, 0, 1, 1], [], []>} : vector<4x12xf32>, vector<12x256xf32>, vector<4x256xf32> -> vector<4x256xf32>
    %224 = arith.mulf %223, %17 : vector<4x256xf32>
    %225 = arith.addf %220, %224 : vector<4x256xf32>
    %c196 = arith.constant 196 : index
    %c0_188 = arith.constant 0 : index
    %226 = vector.load %arg2[%c196, %c0_188] : memref<240x17xf32, #tpu.memory_space<vmem>>, vector<4x12xf32>
    %c0_189 = arith.constant 0 : index
    %c127_190 = arith.constant 127 : index
    %227 = vector.load %arg5[%c0_189, %c127_190] : memref<16x512xf32, #tpu.memory_space<vmem>>, vector<12x256xf32>
    %cst_191 = arith.constant dense<0.000000e+00> : vector<4x256xf32>
    %228 = tpu.matmul %226, %227, %cst_191 {dimension_numbers = #tpu.dot_dimension_numbers<[1], [0], [0], [1], [0, 0, 1, 1], [], []>} : vector<4x12xf32>, vector<12x256xf32>, vector<4x256xf32> -> vector<4x256xf32>
    %229 = arith.mulf %228, %11 : vector<4x256xf32>
    %230 = arith.addf %225, %229 : vector<4x256xf32>
    %c200 = arith.constant 200 : index
    %c0_192 = arith.constant 0 : index
    %231 = vector.load %arg2[%c200, %c0_192] : memref<240x17xf32, #tpu.memory_space<vmem>>, vector<4x12xf32>
    %c0_193 = arith.constant 0 : index
    %c128_194 = arith.constant 128 : index
    %232 = vector.load %arg5[%c0_193, %c128_194] : memref<16x512xf32, #tpu.memory_space<vmem>>, vector<12x256xf32>
    %cst_195 = arith.constant dense<0.000000e+00> : vector<4x256xf32>
    %233 = tpu.matmul %231, %232, %cst_195 {dimension_numbers = #tpu.dot_dimension_numbers<[1], [0], [0], [1], [0, 0, 1, 1], [], []>} : vector<4x12xf32>, vector<12x256xf32>, vector<4x256xf32> -> vector<4x256xf32>
    %234 = arith.addf %230, %233 : vector<4x256xf32>
    %c204 = arith.constant 204 : index
    %c0_196 = arith.constant 0 : index
    %235 = vector.load %arg2[%c204, %c0_196] : memref<240x17xf32, #tpu.memory_space<vmem>>, vector<4x12xf32>
    %c0_197 = arith.constant 0 : index
    %c129_198 = arith.constant 129 : index
    %236 = vector.load %arg5[%c0_197, %c129_198] : memref<16x512xf32, #tpu.memory_space<vmem>>, vector<12x256xf32>
    %cst_199 = arith.constant dense<0.000000e+00> : vector<4x256xf32>
    %237 = tpu.matmul %235, %236, %cst_199 {dimension_numbers = #tpu.dot_dimension_numbers<[1], [0], [0], [1], [0, 0, 1, 1], [], []>} : vector<4x12xf32>, vector<12x256xf32>, vector<4x256xf32> -> vector<4x256xf32>
    %238 = arith.mulf %237, %17 : vector<4x256xf32>
    %239 = arith.addf %234, %238 : vector<4x256xf32>
    %c208 = arith.constant 208 : index
    %c0_200 = arith.constant 0 : index
    %240 = vector.load %arg2[%c208, %c0_200] : memref<240x17xf32, #tpu.memory_space<vmem>>, vector<4x12xf32>
    %c0_201 = arith.constant 0 : index
    %c143_202 = arith.constant 143 : index
    %241 = vector.load %arg5[%c0_201, %c143_202] : memref<16x512xf32, #tpu.memory_space<vmem>>, vector<12x256xf32>
    %cst_203 = arith.constant dense<0.000000e+00> : vector<4x256xf32>
    %242 = tpu.matmul %240, %241, %cst_203 {dimension_numbers = #tpu.dot_dimension_numbers<[1], [0], [0], [1], [0, 0, 1, 1], [], []>} : vector<4x12xf32>, vector<12x256xf32>, vector<4x256xf32> -> vector<4x256xf32>
    %243 = arith.mulf %242, %11 : vector<4x256xf32>
    %244 = arith.addf %239, %243 : vector<4x256xf32>
    %c212 = arith.constant 212 : index
    %c0_204 = arith.constant 0 : index
    %245 = vector.load %arg2[%c212, %c0_204] : memref<240x17xf32, #tpu.memory_space<vmem>>, vector<4x12xf32>
    %c0_205 = arith.constant 0 : index
    %c144_206 = arith.constant 144 : index
    %246 = vector.load %arg5[%c0_205, %c144_206] : memref<16x512xf32, #tpu.memory_space<vmem>>, vector<12x256xf32>
    %cst_207 = arith.constant dense<0.000000e+00> : vector<4x256xf32>
    %247 = tpu.matmul %245, %246, %cst_207 {dimension_numbers = #tpu.dot_dimension_numbers<[1], [0], [0], [1], [0, 0, 1, 1], [], []>} : vector<4x12xf32>, vector<12x256xf32>, vector<4x256xf32> -> vector<4x256xf32>
    %248 = arith.addf %244, %247 : vector<4x256xf32>
    %c216 = arith.constant 216 : index
    %c0_208 = arith.constant 0 : index
    %249 = vector.load %arg2[%c216, %c0_208] : memref<240x17xf32, #tpu.memory_space<vmem>>, vector<4x12xf32>
    %c0_209 = arith.constant 0 : index
    %c145_210 = arith.constant 145 : index
    %250 = vector.load %arg5[%c0_209, %c145_210] : memref<16x512xf32, #tpu.memory_space<vmem>>, vector<12x256xf32>
    %cst_211 = arith.constant dense<0.000000e+00> : vector<4x256xf32>
    %251 = tpu.matmul %249, %250, %cst_211 {dimension_numbers = #tpu.dot_dimension_numbers<[1], [0], [0], [1], [0, 0, 1, 1], [], []>} : vector<4x12xf32>, vector<12x256xf32>, vector<4x256xf32> -> vector<4x256xf32>
    %252 = arith.mulf %251, %17 : vector<4x256xf32>
    %253 = arith.addf %248, %252 : vector<4x256xf32>
    %254 = vector.broadcast %212 : vector<4x1xf32> to vector<4x256xf32>
    %255 = arith.addf %253, %254 : vector<4x256xf32>
    %cst_212 = arith.constant 0.000000e+00 : f32
    %256 = vector.broadcast %cst_212 : f32 to vector<4x256xf32>
    %257 = arith.maximumf %255, %256 : vector<4x256xf32>
    %c12_213 = arith.constant 12 : index
    %c0_214 = arith.constant 0 : index
    %258 = vector.load %arg4[%c12_213, %c0_214] : memref<16x256xf32, #tpu.memory_space<vmem>>, vector<4x256xf32>
    tpu.vector_store %arg4[%c12_213, %c0_214], %257 {strides = array<i32>} : memref<16x256xf32, #tpu.memory_space<vmem>>, vector<4x256xf32>,
    %c0_215 = arith.constant 0 : index
    %c0_216 = arith.constant 0 : index
    %259 = vector.load %arg4[%c0_215, %c0_216] : memref<16x256xf32, #tpu.memory_space<vmem>>, vector<16x256xf32>
    %c224 = arith.constant 224 : index
    %c0_217 = arith.constant 0 : index
    %260 = vector.load %arg2[%c224, %c0_217] : memref<240x17xf32, #tpu.memory_space<vmem>>, vector<8x16xf32>
    %c224_218 = arith.constant 224 : index
    %c16_219 = arith.constant 16 : index
    %261 = vector.load %arg2[%c224_218, %c16_219] : memref<240x17xf32, #tpu.memory_space<vmem>>, vector<8x1xf32>
    %cst_220 = arith.constant dense<0.000000e+00> : vector<8x256xf32>
    %262 = tpu.matmul %260, %259, %cst_220 {dimension_numbers = #tpu.dot_dimension_numbers<[1], [0], [0], [1], [0, 0, 1, 1], [], []>} : vector<8x16xf32>, vector<16x256xf32>, vector<8x256xf32> -> vector<8x256xf32>
    %263 = vector.broadcast %261 : vector<8x1xf32> to vector<8x256xf32>
    %264 = arith.addf %262, %263 : vector<8x256xf32>
    %c0_221 = arith.constant 0 : index
    %c0_222 = arith.constant 0 : index
    %265 = vector.load %arg4[%c0_221, %c0_222] : memref<16x256xf32, #tpu.memory_space<vmem>>, vector<8x256xf32>
    %266 = arith.addf %264, %265 : vector<8x256xf32>
    %c232 = arith.constant 232 : index
    %c0_223 = arith.constant 0 : index
    %267 = vector.load %arg2[%c232, %c0_223] : memref<240x17xf32, #tpu.memory_space<vmem>>, vector<4x8xf32>
    %c232_224 = arith.constant 232 : index
    %c16_225 = arith.constant 16 : index
    %268 = vector.load %arg2[%c232_224, %c16_225] : memref<240x17xf32, #tpu.memory_space<vmem>>, vector<4x1xf32>
    %cst_226 = arith.constant dense<0.000000e+00> : vector<4x256xf32>
    %269 = tpu.matmul %267, %266, %cst_226 {dimension_numbers = #tpu.dot_dimension_numbers<[1], [0], [0], [1], [0, 0, 1, 1], [], []>} : vector<4x8xf32>, vector<8x256xf32>, vector<4x256xf32> -> vector<4x256xf32>
    %270 = vector.broadcast %268 : vector<4x1xf32> to vector<4x256xf32>
    %271 = arith.addf %269, %270 : vector<4x256xf32>
    %c0_227 = arith.constant 0 : index
    %c0_228 = arith.constant 0 : index
    %c0_229 = arith.constant 0 : index
    %272 = vector.load %arg3[%c0_227, %c0_228, %c0_229] : memref<1x4x256xf32, #tpu.memory_space<vmem>>, vector<1x4x256xf32>
    %273 = vector.shape_cast %272 : vector<1x4x256xf32> to vector<4x256xf32>
    %274 = vector.shape_cast %271 : vector<4x256xf32> to vector<1x4x256xf32>
    tpu.vector_store %arg3[%c0_227, %c0_228, %c0_229], %274 {strides = array<i32>} : memref<1x4x256xf32, #tpu.memory_space<vmem>>, vector<1x4x256xf32>,
    return
  }
  func.func @transform_0(%arg0: i32) -> (i32, i32, i32) {
    %c0_i32 = arith.constant 0 : i32
    %c0_i32_0 = arith.constant 0 : i32
    %c0_i32_1 = arith.constant 0 : i32
    return %arg0, %c0_i32, %c0_i32_0 : i32, i32, i32
  }
  func.func @transform_1(%arg0: i32) -> (i32, i32) {
    %c0_i32 = arith.constant 0 : i32
    %c0_i32_0 = arith.constant 0 : i32
    %c0_i32_1 = arith.constant 0 : i32
    return %c0_i32, %c0_i32_0 : i32, i32
  }
  func.func @transform_2(%arg0: i32) -> (i32, i32, i32) {
    %c0_i32 = arith.constant 0 : i32
    %c0_i32_0 = arith.constant 0 : i32
    %c0_i32_1 = arith.constant 0 : i32
    return %arg0, %c0_i32, %c0_i32_0 : i32, i32, i32
  }
}

</mosaic_0001>

<bundles_post_ra>
// kernel: densenet_apply.1
= control target key start
LH: loop header
LB: loop body
LE: loop exit
PB: predicated region body
PF: predicated region fallthrough
CT: control target
= control target key end

     0   :  { %s5026_s9 = smov 0   ;;  %s5853_s0 = inlined_call_operand.vmem [shape: f32[2,4,256], index: 0, kind: input, shape index: {}]   ;;  %s5854_s1 = inlined_call_operand.vmem [shape: f32[240,17], index: 1, kind: input, shape index: {}]   ;;  %s5855_s2 = inlined_call_operand.vmem [shape: f32[2,4,256], index: 2, kind: output, shape index: {}]  }
   0x1 LB: > { %s4441_s10 = sadd.s32 4294967295, %s4998_s9   ;;  %p4445_p0 = scmp.ge.s32.totalorder %s4998_s9, 1  ;;  %s4998_s9 = sphi %s5026_s9, %s12_s9  }
   0x2   : > { %p112_p1 = scmp.lt.s32.totalorder %s4998_s9, 3 }
   0x4   : > { %p113_p2 = pnand %p4445_p0, %p112_p1 }
   0x5   : > { %p134_p3 = scmp.lt.s32.totalorder (!%p113_p2), %s4441_s10, 1  ;;  %v5000_v0 = vmov (!%p113_p2), 0.0   ;;  %v180_v1 = vld [vmem:[%s5854_s1] sm:$0xff] (!%p113_p2)  ;;  %v5001_v2 = vmov (!%p113_p2), 16   ;;  %v271_v3 = vld [vmem:[%s5854_s1 + $0x8] sm:$0xff] (!%p113_p2)  ;;  %vm191_vm0 = vcmask (!%p113_p2), 1043456  }
   0x6   : > { %116 = sbr.rel (%p113_p2) target bundleno = 3344 (0xd10), region = 28  ;;  %260 = vmatprep.mubr.f32.mxu0 (!%p113_p2), %v5000_v0  ;;  %344 = vmatprep.mubr.f32.mxu1 (!%p113_p2), %v5000_v0  ;;  %vm188_vm1 = vcmask (!%p113_p2), 31744   ;;  %vm277_vm2 = vcmask (!%p113_p2), 64512   ;;  %vm144_vm3 = vcmask (!%p113_p2), 1048440   ;;  %vm147_vm4 = vcmask (!%p113_p2), 138240   ;;  %s5002_s19 = smov (!%p113_p2), 16  }
   0x7   : > { %4749 = vset.pattern.permute.xlu0 (!%p113_p2), %v5001_v2  ;;  %4750 = vset.pattern.permute.xlu1 (!%p113_p2), %v5001_v2  ;;  %145 = vst.msk [vmem:[#allocation3] sm:$0xff] (!%p113_p2), %vm144_vm3, %v5000_v0  ;;  %146 = vst.msk [vmem:[#allocation3 + $0x20] sm:$0xff] (!%p113_p2), %vm144_vm3, %v5000_v0  ;;  %s5003_s20 = smov (!%p113_p2), 17   ;;  %s5004_s21 = smov (!%p113_p2), 1   ;;  %v355_v20 = vld [vmem:[%s5854_s1 + $0x10] sm:$0xf] (!%p113_p2) }
   0x8   : > { %183 = vperm.xlu0 (!%p113_p2), %4749, %v180_v1   ;;  %148 = vst.msk [vmem:[#allocation3 + $0x18] sm:$0xff] (!%p113_p2), %vm147_vm4, %v5000_v0  ;;  %149 = vst.msk [vmem:[#allocation3 + $0x38] sm:$0xff] (!%p113_p2), %vm147_vm4, %v5000_v0  ;;  %s5005_s22 = smov (!%p113_p2), 15   ;;  %s5006_s23 = smov (!%p113_p2), 127   ;;  %v5129_v21 = vld [vmem:[%s5854_s1 + $0x40] sm:$0xf] (!%p113_p2) }
   0x9   : > { %s5007_s24 = smov (!%p113_p2), 113   ;;  %s5008_s25 = smov (!%p113_p2), 112   ;;  %vm455_vm5 = vcmask (!%p113_p2), 130048   ;;  %v448_v39 = vld [vmem:[%s5854_s1 + $0x14] sm:$0xf] (!%p113_p2)  ;;  %vm543_vm6 = vcmask (!%p113_p2), 121856  }
   0xa   : > { %s5009_s26 = smov (!%p113_p2), 111   ;;  %vm806_vm7 = vcmask (!%p113_p2), 1039360   ;;  %v536_v44 = vld [vmem:[%s5854_s1 + $0x18] sm:$0xf] (!%p113_p2)  ;;  %vm633_vm8 = vcmask (!%p113_p2), 7168   ;;  %vm986_vm9 = vcmask (!%p113_p2), 916480  }
   0xb   : > { %v626_v51 = vld [vmem:[%s5854_s1 + $0x1c] sm:$0xf] (!%p113_p2)  ;;  %v793_v53 = vld [vmem:[%s5854_s1 + $0x24] sm:$0xf] (!%p113_p2)  ;;  %v716_v57 = vld [vmem:[%s5854_s1 + $0x20] sm:$0xf] (!%p113_p2) }
   0xc   : > { %274 = vperm.xlu0 (!%p113_p2), %4749, %v271_v3   ;;  %vm896_vm10 = vcmask (!%p113_p2), 924672   ;;  %v889_v63 = vld [vmem:[%s5854_s1 + $0x28] sm:$0xf] (!%p113_p2)  ;;  %vm1074_vm11 = vcmask (!%p113_p2), 908288  }
   0xd   : > { %s5859_s10 = smov (!%p134_p3, %s4441_s10), 1 }
   0xe   : > { %s4544_s13 = sshll.u32 %s5859_s10, 3  ;;  %v5065_v11 = vld [vmem:[#allocation3] sm:$0xff] }
   0xf   : > { %s138_s18 = scalar_lea.vmem %s5853_s0, %s4544_s13  ;;  %449 = vrot.lane.b32.xlu1 %v5065_v11, %s5002_s19  ;;  %v5079_v12 = vld [vmem:[#allocation3 + $0x18] sm:$0xff]  ;;  %s143_s16 = scalar_lea.vmem %s5855_s2, %s4544_s13 }
  0x10   : > { %v179_v4 = vld [vmem:[%s138_s18] sm:$0xff]  ;;  %362 = vrot.lane.b32.xlu0 %v5065_v11, %s5003_s20 }
  0x11   : > { %v187_v5 = vcombine.high %v179_v4, %v179_v4 }
  0x13   : > { %4454 = vmatprep.subr.msk.mxu0 %vm191_vm0, %v187_v5  ;;  %627 = vrot.lane.b32.xlu1 %v5065_v11, %s5004_s21  ;;  %v1067_v5 = vld [vmem:[%s5854_s1 + $0x30] sm:$0xf] }
  0x14   : > { %4455 = vmatpush1.msk.msra.mxu0 %vm191_vm0, %v179_v4  ;;  %537 = vrot.lane.b32.xlu0 %v5065_v11, %s5005_s22 }
  0x15   : > { %4456 = vmatmul.mubr.msk.f32.vlgmr.msra.gmra.mrb[0].mxu0 %vm188_vm1, %v180_v1  ;;  %vm5010_vm1 = vmmov 1  }
  0x16   : > { %439 = vmatprep.mubr.f32.mxu0 %v5000_v0  ;;  %vm5228_vm3 = vmpackc.low %vm191_vm0, %vm5010_vm1 }
  0x17   : > { %804 = vrot.lane.b32.xlu1 %v5079_v12, %s5006_s23 }
  0x18   : > { %894 = vrot.lane.b32.xlu0 %v5079_v12, %s5007_s24 }
  0x81   : > { %v450_v22 = vpop.permute.xlu1 %449 }
  0x85   : > { %v628_v24 = vpop.permute.xlu1 %627 }
  0x87   : > { %v184_v6 = vpop.permute.xlu0 %183 }
  0x89   : > { %v805_v26 = vpop.permute.xlu1 %804 }
  0x8b   : > { %v275_v13 = vpop.permute.xlu0 %274 }
  0x8f   : > { %v363_v23 = vpop.permute.xlu0 %362 }
  0x93   : > { %v538_v25 = vpop.permute.xlu0 %537 }
  0x97   : > { %v5134_v27 = vpop.permute.xlu0 %894 }
  0xe8   : > { %v262_v7 = vpop.f32.mrb[0].mxu0 }
  0xe9   : > { %v5053_v8 = vadd.f32 %v262_v7, %v184_v6  ;;  %v264_v9 = vpop.f32.mrb[1].mxu0  ;;  %v5200_v7 = vld [vmem:[%s5854_s1 + $0x38] sm:$0xff] }
  0xea   : > { %v5055_v10 = vadd.f32 %v264_v9, %v184_v6  ;;  %v150_v9 = vlaneseq }
  0xeb   : > { %267 = vst [vmem:[#allocation2] sm:$0xff] %v5053_v8 }
  0xec   : > { %268 = vst [vmem:[#allocation2 + $0x8] sm:$0xff] %v5055_v10  ;;  %280 = vmatprep.subr.mxu1 %v5055_v10 }
  0xed   : > { %281 = vmatpush1.msra.mxu1 %v5053_v8 }
  0xee   : > { %4457 = vmatmul.mubr.msk.f32.vlgmr.msra.gmra.mrb[0].mxu1 %vm277_vm2, %v271_v3  ;;  %v979_v3 = vld [vmem:[%s5854_s1 + $0x2c] sm:$0xf] }
  0xef   : > { %527 = vmatprep.mubr.f32.mxu1 %v5000_v0 }
 0x1c1   : > { %v346_v14 = vpop.f32.mrb[0].mxu1 }
 0x1c2   : > { %v347_v15 = vadd.f32 %v346_v14, %v275_v13  ;;  %v348_v16 = vpop.f32.mrb[1].mxu1 }
 0x1c3   : > { %v349_v18 = vadd.f32 %v348_v16, %v275_v13  ;;  %v151_v13 = vand.u32 127, %v150_v9 }
 0x1c4   : > { %v5085_v17 = vmax.f32 %v347_v15, 0.0 }
 0x1c5   : > { %v5095_v19 = vmax.f32 %v349_v18, 0.0  ;;  %v152_v14 = vadd.s32 128, %v151_v13  ;;  %v157_v15 = vand.u32 15, %v151_v13 }
 0x1c6   : > { %451 = vrot.lane.b32.xlu0 %v5085_v17, %s5002_s19  ;;  %364 = vrot.lane.b32.xlu1 %v5085_v17, %s5003_s20 }
 0x1c7   : > { %v164_v16 = vand.u32 15, %v152_v14  ;;  %vm167_vm12 = vcmp.ne.s32.totalorder %v157_v15, 0  ;;  %vm173_vm14 = vcmp.ne.s32.totalorder %v157_v15, 15 }
 0x1c9   : > { %vm168_vm13 = vcmp.ne.s32.totalorder %v164_v16, 0  ;;  %vm174_vm15 = vcmp.ne.s32.totalorder %v164_v16, 15 }
 0x1ca   : > { %539 = vrot.lane.b32.xlu0 %v5085_v17, %s5005_s22  ;;  %890 = vrot.lane.b32.xlu1 %v5085_v17, %s5007_s24 }
 0x1ce   : > { %629 = vrot.lane.b32.xlu0 %v5085_v17, %s5004_s21  ;;  %366 = vrot.lane.b32.xlu1 %v5095_v19, %s5003_s20 }
 0x1d2   : > { %800 = vrot.lane.b32.xlu0 %v5085_v17, %s5006_s23  ;;  %453 = vrot.lane.b32.xlu1 %v5095_v19, %s5002_s19 }
 0x1d6   : > { %802 = vrot.lane.b32.xlu0 %v5095_v19, %s5006_s23  ;;  %541 = vrot.lane.b32.xlu1 %v5095_v19, %s5005_s22 }
 0x1da   : > { %982 = vrot.lane.b32.xlu0 %v5095_v19, %s5008_s25  ;;  %631 = vrot.lane.b32.xlu1 %v5095_v19, %s5004_s21 }
 0x1de   : > { %1070 = vrot.lane.b32.xlu0 %v5095_v19, %s5009_s26  ;;  %984 = vrot.lane.b32.xlu1 %v5079_v12, %s5008_s25 }
 0x1e2   : > { %980 = vrot.lane.b32.xlu0 %v5085_v17, %s5008_s25  ;;  %892 = vrot.lane.b32.xlu1 %v5095_v19, %s5007_s24 }
 0x1e6   : > { %1158 = vperm.xlu0 %4749, %v355_v20   ;;  %1072 = vrot.lane.b32.xlu1 %v5079_v12, %s5009_s26 }
 0x1ea   : > { %1180 = vperm.xlu0 %4749, %v5129_v21   ;;  %1068 = vrot.lane.b32.xlu1 %v5085_v17, %s5009_s26 }
 0x1ee   : > { %1175 = vperm.xlu1 %4750, %v5200_v7  }
 0x238   : > { %v452_v28 = vpop.permute.xlu0 %451  ;;  %v365_v29 = vpop.permute.xlu1 %364 }
 0x239   : > { %v368_v35 = vsel %vm147_vm4, %v363_v23, %v365_v29  ;;  %v456_v40 = vsel %vm455_vm5, %v450_v22, %v452_v28  ;;  %v5210_v22 = vsel %vm173_vm14, 1.0, %v5000_v0 }
 0x23c   : > { %v540_v30 = vpop.permute.xlu0 %539  ;;  %v891_v31 = vpop.permute.xlu1 %890 }
 0x23d   : > { %v544_v45 = vsel %vm543_vm6, %v538_v25, %v540_v30 }
 0x240   : > { %v630_v32 = vpop.permute.xlu0 %629  ;;  %v367_v33 = vpop.permute.xlu1 %366 }
 0x241   : > { %v369_v34 = vsel %vm147_vm4, %v365_v29, %v367_v33  ;;  %v634_v52 = vsel %vm633_vm8, %v628_v24, %v630_v32  ;;  %v5214_v24 = vsel %vm174_vm15, 1.0, %v5000_v0 }
 0x242   : > { %375 = vmatprep.subr.mxu0 %v369_v34 }
 0x243   : > { %376 = vmatpush1.msra.mxu0 %v368_v35 }
 0x244   : > { %v801_v36 = vpop.permute.xlu0 %800  ;;  %v454_v37 = vpop.permute.xlu1 %453  ;;  %4458 = vmatmul.mubr.msk.f32.vlgmr.msra.gmra.mrb[2].mxu0 %vm277_vm2, %v355_v20  ;;  %v5207_v20 = vsel %vm168_vm13, 1.0, %v5000_v0 }
 0x245   : > { %v457_v38 = vsel %vm455_vm5, %v452_v28, %v454_v37  ;;  %615 = vmatprep.mubr.f32.mxu0 %v5000_v0 }
 0x246   : > { %463 = vmatprep.subr.mxu1 %v457_v38 }
 0x247   : > { %464 = vmatpush1.msra.mxu1 %v456_v40 }
 0x248   : > { %v803_v41 = vpop.permute.xlu0 %802  ;;  %v542_v42 = vpop.permute.xlu1 %541  ;;  %4459 = vmatmul.mubr.msk.f32.vlgmr.msra.gmra.mrb[2].mxu1 %vm277_vm2, %v448_v39 }
 0x249   : > { %v545_v43 = vsel %vm543_vm6, %v540_v30, %v542_v42  ;;  %705 = vmatprep.mubr.f32.mxu1 %v5000_v0  ;;  %v808_v46 = vsel %vm806_vm7, %v803_v41, %v805_v26  ;;  %v807_v47 = vsel %vm806_vm7, %v801_v36, %v803_v41 }
 0x24a   : > { %551 = vmatprep.subr.mxu0 %v545_v43 }
 0x24b   : > { %552 = vmatpush1.msra.mxu0 %v544_v45 }
 0x24c   : > { %v983_v48 = vpop.permute.xlu0 %982  ;;  %814 = vmatprep.subr.mxu0 %v808_v46  ;;  %v632_v49 = vpop.permute.xlu1 %631  ;;  %4460 = vmatmul.mubr.msk.f32.vlgmr.msra.gmra.mrb[4].mxu0 %vm277_vm2, %v536_v44 }
 0x24d   : > { %815 = vmatpush1.msra.mxu0 %v807_v47  ;;  %v635_v50 = vsel %vm633_vm8, %v630_v32, %v632_v49  ;;  %878 = vmatprep.mubr.f32.mxu0 %v5000_v0 }
 0x24e   : > { %641 = vmatprep.subr.mxu1 %v635_v50 }
 0x24f   : > { %642 = vmatpush1.msra.mxu1 %v634_v52 }
 0x250   : > { %v1071_v54 = vpop.permute.xlu0 %1070  ;;  %4461 = vmatmul.mubr.msk.f32.vlgmr.msra.gmra.mrb[4].mxu1 %vm277_vm2, %v626_v51  ;;  %720 = vmatprep.subr.mxu1 %v5095_v19  ;;  %v985_v55 = vpop.permute.xlu1 %984  ;;  %v5204_v19 = vsel %vm167_vm12, 1.0, %v5000_v0  ;;  %vm1183_vm12 = vcmask 97280  }
 0x251   : > { %721 = vmatpush1.msra.mxu1 %v5085_v17  ;;  %4463 = vmatmul.mubr.msk.f32.vlgmr.msra.gmra.mrb[6].mxu0 %vm277_vm2, %v793_v53  ;;  %v988_v56 = vsel %vm986_vm9, %v983_v48, %v985_v55 }
 0x252   : > { %994 = vmatprep.subr.mxu1 %v988_v56  ;;  %784 = vmatprep.mubr.f32.mxu1 %v5000_v0 }
 0x253   : > { %968 = vmatprep.mubr.f32.mxu0 %v5000_v0 }
 0x254   : > { %v981_v58 = vpop.permute.xlu0 %980  ;;  %4462 = vmatmul.mubr.msk.f32.vlgmr.msra.gmra.mrb[2].mxu1 %vm277_vm2, %v716_v57  ;;  %v893_v59 = vpop.permute.xlu1 %892 }
 0x255   : > { %v987_v60 = vsel %vm986_vm9, %v981_v58, %v983_v48  ;;  %v897_v61 = vsel %vm896_vm10, %v891_v31, %v893_v59  ;;  %v898_v62 = vsel %vm896_vm10, %v893_v59, %v5134_v27  ;;  %1058 = vmatprep.mubr.f32.mxu1 %v5000_v0 }
 0x256   : > { %904 = vmatprep.subr.mxu0 %v898_v62  ;;  %995 = vmatpush1.msra.mxu1 %v987_v60 }
 0x257   : > { %905 = vmatpush1.msra.mxu0 %v897_v61 }
 0x258   : > { %4464 = vmatmul.mubr.msk.f32.vlgmr.msra.gmra.mrb[8].mxu0 %vm277_vm2, %v889_v63  ;;  %v1073_v1 = vpop.permute.xlu1 %1072 }
 0x259   : > { %v1076_v2 = vsel %vm1074_vm11, %v1071_v54, %v1073_v1  ;;  %1146 = vmatprep.mubr.f32.mxu0 %v5000_v0 }
 0x25a   : > { %1082 = vmatprep.subr.mxu0 %v1076_v2 }
 0x25c   : > { %4465 = vmatmul.mubr.msk.f32.vlgmr.msra.gmra.mrb[2].mxu1 %vm277_vm2, %v979_v3  ;;  %v1069_v4 = vpop.permute.xlu1 %1068 }
 0x25d   : > { %v1075_v6 = vsel %vm1074_vm11, %v1069_v4, %v1071_v54  ;;  %1258 = vmatprep.mubr.f32.mxu1 %v5000_v0 }
 0x25e   : > { %1083 = vmatpush1.msra.mxu0 %v1075_v6 }
 0x25f   : > { %4466 = vmatmul.mubr.msk.f32.vlgmr.msra.gmra.mrb[10].mxu0 %vm277_vm2, %v1067_v5 }
 0x260   : > { %1381 = vmatprep.mubr.f32.mxu0 %v5000_v0 }
 0x265   : > { %v1159_v59 = vpop.permute.xlu0 %1158 }
 0x26d   : > { %v1176_v9 = vpop.permute.xlu1 %1175 }
 0x317   : > { %v441_v17 = vpop.f32.mrb[2].mxu0 }
 0x318   : > { %v443_v18 = vpop.f32.mrb[3].mxu0  ;;  %v446_v23 = vmul.f32 %v5204_v19, %v441_v17 }
 0x319   : > { %v447_v25 = vmul.f32 %v5207_v20, %v443_v18 }
 0x31f   : > { %v617_v26 = vpop.f32.mrb[4].mxu0 }
 0x320   : > { %v622_v27 = vmul.f32 %v5210_v22, %v617_v26  ;;  %v619_v28 = vpop.f32.mrb[5].mxu0 }
 0x321   : > { %v623_v29 = vmul.f32 %v5214_v24, %v619_v28 }
 0x322   : > { %v4674_v30 = vadd.f32 %v622_v27, %v446_v23 }
 0x323   : > { %v4679_v31 = vadd.f32 %v623_v29, %v447_v25  ;;  %v707_v32 = vpop.f32.mrb[4].mxu1 }
 0x324   : > { %v712_v33 = vmul.f32 %v5204_v19, %v707_v32  ;;  %v709_v34 = vpop.f32.mrb[5].mxu1  ;;  %v880_v35 = vpop.f32.mrb[6].mxu0 }
 0x325   : > { %v713_v36 = vmul.f32 %v5207_v20, %v709_v34  ;;  %v885_v37 = vmul.f32 %v5210_v22, %v880_v35  ;;  %v882_v38 = vpop.f32.mrb[7].mxu0 }
 0x326   : > { %v4675_v39 = vadd.f32 %v4674_v30, %v712_v33  ;;  %v886_v40 = vmul.f32 %v5214_v24, %v882_v38  ;;  %v5289_v38 = vld [vmem:[%s5854_s1 + $0x78] sm:$0xff] }
 0x327   : > { %v4680_v41 = vadd.f32 %v4679_v31, %v713_v36  ;;  %v1778_v36 = vld [vmem:[#allocation3 + $0x38] sm:$0xf] }
 0x328   : > { %v4676_v42 = vadd.f32 %v4675_v39, %v885_v37  ;;  %v1279_v37 = vld [vmem:[%s5854_s1 + $0x48] sm:$0xf]  ;;  %v5296_v39 = vld [vmem:[%s5854_s1 + $0x70] sm:$0xff] }
 0x329   : > { %v4681_v43 = vadd.f32 %v4680_v41, %v886_v40 }
 0x32b   : > { %v970_v44 = vpop.f32.mrb[8].mxu0 }
 0x32c   : > { %v975_v45 = vmul.f32 %v5204_v19, %v970_v44  ;;  %v972_v46 = vpop.f32.mrb[9].mxu0 }
 0x32d   : > { %v976_v47 = vmul.f32 %v5207_v20, %v972_v46 }
 0x32e   : > { %v4677_v48 = vadd.f32 %v4676_v42, %v975_v45 }
 0x32f   : > { %v1060_v49 = vpop.f32.mrb[2].mxu1  ;;  %v4682_v50 = vadd.f32 %v4681_v43, %v976_v47 }
 0x330   : > { %v4678_v51 = vadd.f32 %v4677_v48, %v1060_v49  ;;  %v1062_v52 = vpop.f32.mrb[3].mxu1 }
 0x331   : > { %v4683_v53 = vadd.f32 %v4682_v50, %v1062_v52 }
 0x332   : > { %v1148_v54 = vpop.f32.mrb[10].mxu0 }
 0x333   : > { %v1153_v55 = vmul.f32 %v5210_v22, %v1148_v54  ;;  %v1150_v56 = vpop.f32.mrb[11].mxu0 }
 0x334   : > { %v1154_v57 = vmul.f32 %v5214_v24, %v1150_v56 }
 0x335   : > { %v1155_v58 = vadd.f32 %v4678_v51, %v1153_v55 }
 0x336   : > { %v1156_v60 = vadd.f32 %v4683_v53, %v1154_v57 }
 0x337   : > { %v1161_v61 = vadd.f32 %v1159_v59, %v1155_v58 }
 0x338   : > { %v1162_v62 = vadd.f32 %v1159_v59, %v1156_v60 }
 0x339   : > { %v1163_v63 = vmax.f32 %v1161_v61, 0.0 }
 0x33a   : > { %v1164_v1 = vmax.f32 %v1162_v62, 0.0 }
 0x33b   : > { %1165 = vst [vmem:[#allocation2 + $0x10] sm:$0xf] %v1163_v63 }
 0x33c   : > { %1166 = vst [vmem:[#allocation2 + $0x18] sm:$0xf] %v1164_v1 }
 0x342   : > { %v1169_v2 = vld [vmem:[#allocation2 + $0x10] sm:$0xf] }
 0x343   : > { %v1170_v4 = vld [vmem:[#allocation2 + $0x18] sm:$0xf]  ;;  %v4549_v6 = vpack.c.bf16 %v1169_v2, %v5053_v8 }
 0x344   : > { %v4546_v5 = vpack.c.bf16 %v1170_v4, %v5055_v10  ;;  %v1283_v10 = vld [vmem:[#allocation3 + $0x20] sm:$0xf] }
 0x345   : > { %v4756_v8 = vpack.i.bf16 %v1283_v10, %v5065_v11 }
 0x346   : > { %4548 = vmatprep.subr.msk.bf16.mxu1 %vm5228_vm3, %v4546_v5 }
 0x347   : > { %4551 = vmatpush1.bf16.msk.msra.mxu1 %vm5228_vm3, %v4549_v6  ;;  %4757 = vrot.lane.b32.xlu0 %v4756_v8, %s5002_s19 }
 0x348   : > { %4752 = vrot.lane.b32.xlu1 %v4756_v8, %s5003_s20 }
 0x34a   : > { %4469 = vmatmul.mubr.msk.f32.vlgmr.msra.gmra.mrb[6].mxu1 %vm1183_vm12, %v5200_v7 }
 0x34b   : > { %1264 = vmatprep.mubr.f32.mxu1 %v5000_v0  ;;  %4767 = vrot.lane.b32.xlu0 %v4756_v8, %s5004_s21 }
 0x34c   : > { %4762 = vrot.lane.b32.xlu1 %v4756_v8, %s5005_s22 }
 0x34e   : > { %4470 = vmatmul.mubr.msk.f32.gmra.mrb[8].mxu1 %vm1183_vm12, %v5129_v21  ;;  %v1181_v21 = vpop.permute.xlu0 %1180 }
 0x34f   : > { %1579 = vmatprep.mubr.f32.mxu1 %v5000_v0 }
 0x3b9   : > { %v4758_v42 = vpop.permute.xlu0 %4757 }
 0x3ba   : > { %v4753_v40 = vpop.permute.xlu1 %4752  ;;  %v4759_v56 = vunpack.i.l.bf16 %v4758_v42  ;;  %v4760_v5 = vunpack.i.h.bf16 %v4758_v42 }
 0x3bb   : > { %v4754_v48 = vunpack.i.l.bf16 %v4753_v40  ;;  %v4755_v53 = vunpack.i.h.bf16 %v4753_v40 }
 0x3bd   : > { %v5299_v44 = vpop.permute.xlu0 %4767 }
 0x3be   : > { %v4763_v41 = vpop.permute.xlu1 %4762 }
 0x41d   : > { %v1260_v7 = vpop.f32.mrb[6].mxu1 }
 0x41e   : > { %v1261_v13 = vadd.f32 %v1260_v7, %v1176_v9  ;;  %v1262_v14 = vpop.f32.mrb[7].mxu1 }
 0x41f   : > { %v1263_v15 = vadd.f32 %v1262_v14, %v1176_v9 }
 0x420   : > { %v5249_v16 = vmax.f32 %v1261_v13, 0.0 }
 0x421   : > { %v5251_v17 = vmax.f32 %v1263_v15, 0.0  ;;  %v1266_v18 = vpop.f32.mrb[8].mxu1 }
 0x422   : > { %v1267_v11 = vadd.f32 %v1266_v18, %v1181_v21  ;;  %v1268_v23 = vpop.f32.mrb[9].mxu1 }
 0x423   : > { %v1269_v25 = vadd.f32 %v1268_v23, %v1181_v21  ;;  %v4776_v26 = vpack.i.bf16 %v5251_v17, %v5249_v16  ;;  %v4811_v32 = vpack.i.bf16 %v5079_v12, %v5251_v17 }
 0x424   : > { %v1273_v27 = vmax.f32 %v1267_v11, 0.0  ;;  %v4764_v11 = vunpack.i.l.bf16 %v4763_v41 }
 0x425   : > { %v1274_v28 = vmax.f32 %v1269_v25, 0.0  ;;  %4777 = vrot.lane.b32.xlu0 %v4776_v26, %s5002_s19  ;;  %4772 = vrot.lane.b32.xlu1 %v4776_v26, %s5003_s20 }
 0x426   : > { %1277 = vst [vmem:[#allocation3 + $0x28] sm:$0xf] %v1273_v27 }
 0x427   : > { %1278 = vst [vmem:[#allocation3 + $0x30] sm:$0xf] %v1274_v28 }
 0x429   : > { %4782 = vrot.lane.b32.xlu1 %v4776_v26, %s5005_s22 }
 0x42d   : > { %v5258_v29 = vld [vmem:[#allocation3 + $0x28] sm:$0xf]  ;;  %4787 = vrot.lane.b32.xlu1 %v4776_v26, %s5004_s21  ;;  %v1390_v26 = vld [vmem:[%s5854_s1 + $0x4c] sm:$0xf] }
 0x42e   : > { %v5261_v30 = vld [vmem:[#allocation3 + $0x30] sm:$0xf]  ;;  %v1776_v33 = vld [vmem:[#allocation3 + $0x28] sm:$0xf] }
 0x42f   : > { %v4796_v31 = vpack.i.bf16 %v5261_v30, %v5258_v29  ;;  %v4816_v34 = vpack.i.bf16 %v1776_v33, %v5249_v16  ;;  %v1777_v35 = vld [vmem:[#allocation3 + $0x30] sm:$0xf] }
 0x430   : > { %v4841_v12 = vpack.i.bf16 %v1778_v36, %v1777_v35  ;;  %v4769_v35 = vunpack.i.l.bf16 %v5299_v44 }
 0x431   : > { %4797 = vrot.lane.b32.xlu0 %v4796_v31, %s5003_s20  ;;  %4792 = vrot.lane.b32.xlu1 %v4811_v32, %s5006_s23 }
 0x435   : > { %4812 = vrot.lane.b32.xlu0 %v4811_v32, %s5007_s24  ;;  %4802 = vrot.lane.b32.xlu1 %v4796_v31, %s5002_s19 }
 0x439   : > { %4817 = vrot.lane.b32.xlu0 %v4816_v34, %s5007_s24  ;;  %4807 = vrot.lane.b32.xlu1 %v4816_v34, %s5006_s23 }
 0x43d   : > { %4827 = vrot.lane.b32.xlu0 %v4796_v31, %s5005_s22  ;;  %4822 = vrot.lane.b32.xlu1 %v4811_v32, %s5008_s25 }
 0x441   : > { %4832 = vrot.lane.b32.xlu0 %v4796_v31, %s5004_s21  ;;  %4842 = vrot.lane.b32.xlu1 %v4841_v12, %s5007_s24 }
 0x445   : > { %4837 = vrot.lane.b32.xlu0 %v4841_v12, %s5006_s23  ;;  %4847 = vrot.lane.b32.xlu1 %v4811_v32, %s5009_s26  ;;  %v4765_v32 = vunpack.i.h.bf16 %v4763_v41  ;;  %v4770_v41 = vunpack.i.h.bf16 %v5299_v44 }
 0x449   : > { %4857 = vrot.lane.b32.xlu0 %v4841_v12, %s5008_s25  ;;  %4852 = vrot.lane.b32.xlu1 %v4816_v34, %s5008_s25 }
 0x44d   : > { %4862 = vrot.lane.b32.xlu0 %v4841_v12, %s5009_s26  ;;  %2187 = vperm.xlu1 %4750, %v1279_v37  }
 0x451   : > { %4867 = vrot.lane.b32.xlu0 %v4816_v34, %s5009_s26  ;;  %2296 = vperm.xlu1 %4750, %v5289_v38  }
 0x455   : > { %2209 = vperm.xlu0 %4749, %v5296_v39  }
 0x497   : > { %v4773_v43 = vpop.permute.xlu1 %4772  ;;  %v4778_v46 = vpop.permute.xlu0 %4777 }
 0x498   : > { %v4775_v49 = vunpack.i.h.bf16 %v4773_v43  ;;  %v4774_v50 = vunpack.i.l.bf16 %v4773_v43  ;;  %v4780_v57 = vunpack.i.h.bf16 %v4778_v46  ;;  %v4779_v58 = vunpack.i.l.bf16 %v4778_v46 }
 0x49a   : > { %v1304_v59 = vsel %vm147_vm4, %v4754_v48, %v4774_v50  ;;  %v1305_v60 = vsel %vm147_vm4, %v4774_v50, %v4775_v49  ;;  %v1403_v8 = vsel %vm455_vm5, %v4759_v56, %v4779_v58  ;;  %v1404_v9 = vsel %vm455_vm5, %v4779_v58, %v4780_v57 }
 0x49b   : > { %v4783_v45 = vpop.permute.xlu1 %4782 }
 0x49c   : > { %v4785_v23 = vunpack.i.h.bf16 %v4783_v45  ;;  %v4784_v25 = vunpack.i.l.bf16 %v4783_v45 }
 0x49e   : > { %v1502_v12 = vsel %vm543_vm6, %v4764_v11, %v4784_v25 }
 0x49f   : > { %v5301_v47 = vpop.permute.xlu1 %4787 }
 0x4a0   : > { %v4789_v27 = vunpack.i.l.bf16 %v5301_v47  ;;  %v4790_v36 = vunpack.i.h.bf16 %v5301_v47 }
 0x4a2   : > { %v1603_v43 = vsel %vm633_vm8, %v4769_v35, %v4789_v27  ;;  %v1604_v56 = vsel %vm633_vm8, %v4789_v27, %v4790_v36 }
 0x4a3   : > { %v4798_v51 = vpop.permute.xlu0 %4797  ;;  %v5303_v52 = vpop.permute.xlu1 %4792 }
 0x4a4   : > { %v4800_v54 = vunpack.i.h.bf16 %v4798_v51  ;;  %v4799_v55 = vunpack.i.l.bf16 %v4798_v51  ;;  %v4795_v49 = vunpack.i.h.bf16 %v5303_v52  ;;  %v4794_v50 = vunpack.i.l.bf16 %v5303_v52  ;;  %v1489_v52 = vld [vmem:[%s5854_s1 + $0x50] sm:$0xf] }
 0x4a6   : > { %v1306_v61 = vsel %vm147_vm4, %v4755_v53, %v4799_v55  ;;  %v1307_v62 = vsel %vm147_vm4, %v4799_v55, %v4800_v54 }
 0x4a7   : > { %v4552_v63 = vpack.c.bf16 %v1307_v62, %v1305_v60  ;;  %v4555_v1 = vpack.c.bf16 %v1306_v61, %v1304_v59  ;;  %v5309_v2 = vpop.permute.xlu0 %4812  ;;  %v4803_v4 = vpop.permute.xlu1 %4802 }
 0x4a8   : > { %v4805_v6 = vunpack.i.h.bf16 %v4803_v4  ;;  %v4804_v10 = vunpack.i.l.bf16 %v4803_v4  ;;  %v4815_v54 = vunpack.i.h.bf16 %v5309_v2  ;;  %v4814_v55 = vunpack.i.l.bf16 %v5309_v2 }
 0x4a9   : > { %4554 = vmatprep.subr.msk.bf16.mxu0 %vm5228_vm3, %v4552_v63  ;;  %v4579_v2 = vpack.c.bf16 %v5258_v29, %v5249_v16 }
 0x4aa   : > { %4557 = vmatpush1.bf16.msk.msra.mxu0 %vm5228_vm3, %v4555_v1  ;;  %v1405_v7 = vsel %vm455_vm5, %v4760_v5, %v4804_v10  ;;  %v1406_v13 = vsel %vm455_vm5, %v4804_v10, %v4805_v6  ;;  %v4576_v1 = vpack.c.bf16 %v5261_v30, %v5251_v17  ;;  %v1798_v5 = vsel %vm806_vm7, %v4794_v50, %v4795_v49  ;;  %v1590_v30 = vld [vmem:[%s5854_s1 + $0x54] sm:$0xf] }
 0x4ab   : > { %v5319_v14 = vpop.permute.xlu0 %4817  ;;  %v4558_v15 = vpack.c.bf16 %v1406_v13, %v1404_v9  ;;  %v4561_v21 = vpack.c.bf16 %v1405_v7, %v1403_v8  ;;  %v4808_v18 = vpop.permute.xlu1 %4807  ;;  %v1899_v9 = vsel %vm896_vm10, %v4814_v55, %v4815_v54  ;;  %v1885_v54 = vld [vmem:[%s5854_s1 + $0x60] sm:$0xf] }
 0x4ac   : > { %v4809_v57 = vunpack.i.l.bf16 %v4808_v18  ;;  %v4810_v6 = vunpack.i.h.bf16 %v4808_v18  ;;  %v4819_v18 = vunpack.i.l.bf16 %v5319_v14 }
 0x4ad   : > { %4473 = vmatmul.mubr.msk.f32.vlgmr.msra.gmra.mrb[12].mxu0 %vm1183_vm12, %v1279_v37  ;;  %4560 = vmatprep.subr.msk.bf16.mxu0 %vm5228_vm3, %v4558_v15  ;;  %v1503_v37 = vsel %vm543_vm6, %v4784_v25, %v4785_v23 }
 0x4ae   : > { %4563 = vmatpush1.bf16.msk.msra.mxu0 %vm5228_vm3, %v4561_v21  ;;  %1480 = vmatprep.mubr.f32.mxu0 %v5000_v0  ;;  %v1797_v7 = vsel %vm806_vm7, %v4809_v57, %v4794_v50  ;;  %v4820_v21 = vunpack.i.h.bf16 %v5319_v14 }
 0x4af   : > { %v4828_v28 = vpop.permute.xlu0 %4827  ;;  %v5331_v31 = vpop.permute.xlu1 %4822 }
 0x4b0   : > { %v4830_v33 = vunpack.i.h.bf16 %v4828_v28  ;;  %v4829_v34 = vunpack.i.l.bf16 %v4828_v28  ;;  %v4825_v13 = vunpack.i.h.bf16 %v5331_v31  ;;  %v4824_v15 = vunpack.i.l.bf16 %v5331_v31 }
 0x4b1   : > { %4476 = vmatmul.mubr.msk.f32.vlgmr.msra.gmra.mrb[14].mxu0 %vm1183_vm12, %v1390_v26 }
 0x4b2   : > { %v1504_v40 = vsel %vm543_vm6, %v4765_v32, %v4829_v34  ;;  %v1505_v42 = vsel %vm543_vm6, %v4829_v34, %v4830_v33  ;;  %1680 = vmatprep.mubr.f32.mxu0 %v5000_v0  ;;  %v2000_v33 = vsel %vm986_vm9, %v4824_v15, %v4825_v13 }
 0x4b3   : > { %v4564_v45 = vpack.c.bf16 %v1505_v42, %v1503_v37  ;;  %v4567_v46 = vpack.c.bf16 %v1504_v40, %v1502_v12  ;;  %v4833_v48 = vpop.permute.xlu0 %4832  ;;  %v4843_v47 = vpop.permute.xlu1 %4842  ;;  %v1772_v37 = vld [vmem:[%s5854_s1 + $0x5c] sm:$0xf] }
 0x4b4   : > { %v4835_v51 = vunpack.i.h.bf16 %v4833_v48  ;;  %v4834_v53 = vunpack.i.l.bf16 %v4833_v48  ;;  %v4845_v59 = vunpack.i.h.bf16 %v4843_v47  ;;  %v4844_v60 = vunpack.i.l.bf16 %v4843_v47  ;;  %v1691_v48 = vld [vmem:[%s5854_s1 + $0x58] sm:$0xf] }
 0x4b5   : > { %4566 = vmatprep.subr.msk.bf16.mxu1 %vm5228_vm3, %v4564_v45 }
 0x4b6   : > { %v1605_v44 = vsel %vm633_vm8, %v4770_v41, %v4834_v53  ;;  %v1606_v58 = vsel %vm633_vm8, %v4834_v53, %v4835_v51  ;;  %4569 = vmatpush1.bf16.msk.msra.mxu1 %vm5228_vm3, %v4567_v46  ;;  %v1901_v29 = vsel %vm896_vm10, %v4844_v60, %v4845_v59  ;;  %v1900_v34 = vsel %vm896_vm10, %v4820_v21, %v4844_v60  ;;  %v1986_v60 = vld [vmem:[%s5854_s1 + $0x64] sm:$0xf] }
 0x4b7   : > { %v4570_v61 = vpack.c.bf16 %v1606_v58, %v1604_v56  ;;  %v4573_v62 = vpack.c.bf16 %v1605_v44, %v1603_v43  ;;  %v4838_v63 = vpop.permute.xlu0 %4837  ;;  %v5361_v4 = vpop.permute.xlu1 %4847  ;;  %v4588_v35 = vpack.c.bf16 %v1901_v29, %v1899_v9  ;;  %v1898_v41 = vsel %vm896_vm10, %v4819_v18, %v4814_v55 }
 0x4b8   : > { %v4840_v10 = vunpack.i.h.bf16 %v4838_v63  ;;  %v4839_v8 = vunpack.i.l.bf16 %v4838_v63  ;;  %v4850_v14 = vunpack.i.h.bf16 %v5361_v4  ;;  %v4849_v12 = vunpack.i.l.bf16 %v5361_v4 }
 0x4b9   : > { %4479 = vmatmul.mubr.msk.f32.vlgmr.msra.gmra.mrb[10].mxu1 %vm1183_vm12, %v1489_v52  ;;  %4572 = vmatprep.subr.msk.bf16.mxu0 %vm5228_vm3, %v4570_v61  ;;  %v4591_v47 = vpack.c.bf16 %v1900_v34, %v1898_v41  ;;  %v2085_v61 = vld [vmem:[%s5854_s1 + $0x68] sm:$0xf] }
 0x4ba   : > { %v1799_v16 = vsel %vm806_vm7, %v4810_v6, %v4839_v8  ;;  %v1800_v17 = vsel %vm806_vm7, %v4839_v8, %v4840_v10  ;;  %4575 = vmatpush1.bf16.msk.msra.mxu0 %vm5228_vm3, %v4573_v62  ;;  %1874 = vmatprep.mubr.f32.mxu1 %v5000_v0  ;;  %v2099_v53 = vsel %vm1074_vm11, %v4849_v12, %v4850_v14 }
 0x4bb   : > { %v4582_v11 = vpack.c.bf16 %v1800_v17, %v1798_v5  ;;  %v4585_v23 = vpack.c.bf16 %v1799_v16, %v1797_v7  ;;  %v4858_v25 = vpop.permute.xlu0 %4857  ;;  %4578 = vmatprep.subr.msk.bf16.mxu0 %vm5228_vm3, %v4576_v1  ;;  %v4853_v26 = vpop.permute.xlu1 %4852 }
 0x4bc   : > { %v4860_v27 = vunpack.i.h.bf16 %v4858_v25  ;;  %v4859_v28 = vunpack.i.l.bf16 %v4858_v25  ;;  %v4855_v31 = vunpack.i.h.bf16 %v4853_v26  ;;  %v4854_v32 = vunpack.i.l.bf16 %v4853_v26 }
 0x4bd   : > { %4482 = vmatmul.mubr.msk.f32.vlgmr.msra.gmra.mrb[16].mxu0 %vm1183_vm12, %v1590_v30  ;;  %4584 = vmatprep.subr.msk.bf16.mxu1 %vm5228_vm3, %v4582_v11 }
 0x4be   : > { %v2002_v36 = vsel %vm986_vm9, %v4859_v28, %v4860_v27  ;;  %4581 = vmatpush1.bf16.msk.msra.mxu0 %vm5228_vm3, %v4579_v2  ;;  %4587 = vmatpush1.bf16.msk.msra.mxu1 %vm5228_vm3, %v4585_v23  ;;  %v2001_v40 = vsel %vm986_vm9, %v4855_v31, %v4859_v28  ;;  %v1999_v42 = vsel %vm986_vm9, %v4854_v32, %v4824_v15 }
 0x4bf   : > { %v4594_v43 = vpack.c.bf16 %v2002_v36, %v2000_v33  ;;  %v4863_v45 = vpop.permute.xlu0 %4862  ;;  %4590 = vmatprep.subr.msk.bf16.mxu1 %vm5228_vm3, %v4588_v35  ;;  %v4597_v46 = vpack.c.bf16 %v2001_v40, %v1999_v42  ;;  %1763 = vmatprep.mubr.f32.mxu0 %v5000_v0 }
 0x4c0   : > { %v4865_v49 = vunpack.i.h.bf16 %v4863_v45  ;;  %v4864_v50 = vunpack.i.l.bf16 %v4863_v45 }
 0x4c1   : > { %4488 = vmatmul.mubr.msk.f32.vlgmr.msra.gmra.mrb[12].mxu1 %vm1183_vm12, %v1772_v37  ;;  %4596 = vmatprep.subr.msk.bf16.mxu0 %vm5228_vm3, %v4594_v43 }
 0x4c2   : > { %v2101_v51 = vsel %vm1074_vm11, %v4864_v50, %v4865_v49  ;;  %4593 = vmatpush1.bf16.msk.msra.mxu1 %vm5228_vm3, %v4591_v47  ;;  %4485 = vmatmul.mubr.msk.f32.vlgmr.msra.gmra.mrb[14].mxu0 %vm1183_vm12, %v1691_v48 }
 0x4c3   : > { %v4600_v55 = vpack.c.bf16 %v2101_v51, %v2099_v53  ;;  %v4868_v56 = vpop.permute.xlu0 %4867  ;;  %1975 = vmatprep.mubr.f32.mxu1 %v5000_v0  ;;  %4599 = vmatpush1.bf16.msk.msra.mxu0 %vm5228_vm3, %v4597_v46 }
 0x4c4   : > { %v4870_v57 = vunpack.i.h.bf16 %v4868_v56  ;;  %v4869_v44 = vunpack.i.l.bf16 %v4868_v56  ;;  %2076 = vmatprep.mubr.f32.mxu0 %v5000_v0 }
 0x4c5   : > { %4491 = vmatmul.mubr.msk.f32.vlgmr.msra.gmra.mrb[14].mxu1 %vm1183_vm12, %v1885_v54  ;;  %4602 = vmatprep.subr.msk.bf16.mxu1 %vm5228_vm3, %v4600_v55  ;;  %v2203_v54 = vld [vmem:[#allocation2 + $0x8] sm:$0xff] }
 0x4c6   : > { %v2098_v58 = vsel %vm1074_vm11, %v4869_v44, %v4849_v12  ;;  %v2100_v52 = vsel %vm1074_vm11, %v4870_v57, %v4864_v50  ;;  %2175 = vmatprep.mubr.f32.mxu1 %v5000_v0  ;;  %v2202_v57 = vld [vmem:[#allocation2] sm:$0xff] }
 0x4c7   : > { %v4603_v59 = vpack.c.bf16 %v2100_v52, %v2098_v58 }
 0x4c9   : > { %4605 = vmatpush1.bf16.msk.msra.mxu1 %vm5228_vm3, %v4603_v59 }
 0x4ca   : > { %4494 = vmatmul.mubr.msk.f32.vlgmr.msra.gmra.mrb[14].mxu0 %vm1183_vm12, %v1986_v60 }
 0x4cb   : > { %2278 = vmatprep.mubr.f32.mxu0 %v5000_v0 }
 0x4cc   : > { %4497 = vmatmul.mubr.msk.f32.vlgmr.msra.gmra.mrb[16].mxu1 %vm1183_vm12, %v2085_v61  ;;  %v2188_v43 = vpop.permute.xlu1 %2187 }
 0x4cd   : > { %2365 = vmatprep.mubr.f32.mxu1 %v5000_v0 }
 0x4d4   : > { %v2210_v58 = vpop.permute.xlu0 %2209 }
 0x580   : > { %v1383_v62 = vpop.f32.mrb[12].mxu0 }
 0x581   : > { %v1385_v63 = vpop.f32.mrb[13].mxu0  ;;  %v1388_v1 = vmul.f32 %v5204_v19, %v1383_v62 }
 0x582   : > { %v1389_v6 = vmul.f32 %v5207_v20, %v1385_v63 }
 0x58c   : > { %v1581_v2 = vpop.f32.mrb[10].mxu1 }
 0x58d   : > { %v1586_v4 = vmul.f32 %v5210_v22, %v1581_v2  ;;  %v1583_v5 = vpop.f32.mrb[11].mxu1 }
 0x58e   : > { %v1587_v10 = vmul.f32 %v5214_v24, %v1583_v5 }
 0x58f   : > { %v4684_v8 = vadd.f32 %v1586_v4, %v1388_v1  ;;  %v5477_v1 = vld [vmem:[#allocation3 + $0x18] sm:$0xff] }
 0x590   : > { %v4689_v9 = vadd.f32 %v1587_v10, %v1389_v6  ;;  %v1682_v7 = vpop.f32.mrb[16].mxu0 }
 0x591   : > { %v1687_v13 = vmul.f32 %v5204_v19, %v1682_v7  ;;  %v1684_v15 = vpop.f32.mrb[17].mxu0  ;;  %v2376_v7 = vld [vmem:[%s5854_s1 + $0x80] sm:$0xf] }
 0x592   : > { %v1688_v16 = vmul.f32 %v5207_v20, %v1684_v15 }
 0x593   : > { %v4685_v17 = vadd.f32 %v4684_v8, %v1687_v13  ;;  %v5535_v13 = vld [vmem:[%s5854_s1 + $0xb0] sm:$0xf] }
 0x594   : > { %v4690_v29 = vadd.f32 %v4689_v9, %v1688_v16  ;;  %v1876_v30 = vpop.f32.mrb[12].mxu1  ;;  %v5526_v9 = vld [vmem:[%s5854_s1 + $0xa8] sm:$0xff] }
 0x595   : > { %v1881_v21 = vmul.f32 %v5210_v22, %v1876_v30  ;;  %v1878_v18 = vpop.f32.mrb[13].mxu1 }
 0x596   : > { %v1882_v11 = vmul.f32 %v5214_v24, %v1878_v18 }
 0x597   : > { %v4686_v23 = vadd.f32 %v4685_v17, %v1881_v21 }
 0x598   : > { %v4691_v25 = vadd.f32 %v4690_v29, %v1882_v11  ;;  %v1977_v26 = vpop.f32.mrb[14].mxu1 }
 0x599   : > { %v1982_v27 = vmul.f32 %v5204_v19, %v1977_v26  ;;  %v1979_v28 = vpop.f32.mrb[15].mxu1 }
 0x59a   : > { %v1983_v31 = vmul.f32 %v5207_v20, %v1979_v28 }
 0x59b   : > { %v4687_v32 = vadd.f32 %v4686_v23, %v1982_v27 }
 0x59c   : > { %v4692_v33 = vadd.f32 %v4691_v25, %v1983_v31 }
 0x59d   : > { %v2078_v34 = vpop.f32.mrb[14].mxu0 }
 0x59e   : > { %v4688_v35 = vadd.f32 %v4687_v32, %v2078_v34  ;;  %v2080_v14 = vpop.f32.mrb[15].mxu0 }
 0x59f   : > { %v2177_v36 = vpop.f32.mrb[16].mxu1  ;;  %v4693_v12 = vadd.f32 %v4692_v33, %v2080_v14  ;;  %v2469_v33 = vld [vmem:[%s5854_s1 + $0x84] sm:$0xf] }
 0x5a0   : > { %v2182_v37 = vmul.f32 %v5210_v22, %v2177_v36  ;;  %v2179_v40 = vpop.f32.mrb[17].mxu1 }
 0x5a1   : > { %v2183_v42 = vmul.f32 %v5214_v24, %v2179_v40 }
 0x5a2   : > { %v2184_v41 = vadd.f32 %v4688_v35, %v2182_v37 }
 0x5a3   : > { %v2185_v45 = vadd.f32 %v4693_v12, %v2183_v42  ;;  %v2556_v12 = vld [vmem:[%s5854_s1 + $0x88] sm:$0xf] }
 0x5a4   : > { %v2190_v46 = vadd.f32 %v2188_v43, %v2184_v41 }
 0x5a5   : > { %v2191_v48 = vadd.f32 %v2188_v43, %v2185_v45  ;;  %v2645_v43 = vld [vmem:[%s5854_s1 + $0x8c] sm:$0xf] }
 0x5a6   : > { %v2192_v47 = vmax.f32 %v2190_v46, 0.0 }
 0x5a7   : > { %v2193_v49 = vmax.f32 %v2191_v48, 0.0 }
 0x5a8   : > { %v2196_v50 = vrot.slane %v2192_v47, 4 }
 0x5a9   : > { %v2197_v51 = vrot.slane %v2193_v49, 4 }
 0x5aa   : > { %2200 = vst [vmem:[#allocation2 + $0x10] sm:$0xf0] %v2196_v50  ;;  %v2811_v50 = vld [vmem:[%s5854_s1 + $0x94] sm:$0xf] }
 0x5ab   : > { %2201 = vst [vmem:[#allocation2 + $0x18] sm:$0xf0] %v2197_v51  ;;  %v2734_v51 = vld [vmem:[%s5854_s1 + $0x90] sm:$0xf] }
 0x5b1   : > { %v2204_v53 = vld [vmem:[#allocation2 + $0x10] sm:$0xff] }
 0x5b2   : > { %v2205_v55 = vld [vmem:[#allocation2 + $0x18] sm:$0xff]  ;;  %v4608_v44 = vpack.c.bf16 %v2204_v53, %v2202_v57 }
 0x5b3   : > { %v4606_v56 = vpack.c.bf16 %v2205_v55, %v2203_v54 }
 0x5b5   : > { %4607 = vmatprep.subr.bf16.mxu0 %v4606_v56 }
 0x5b6   : > { %4609 = vmatpush1.bf16.msra.mxu0 %v4608_v44  ;;  %v2906_v44 = vld [vmem:[%s5854_s1 + $0x98] sm:$0xf] }
 0x5b9   : > { %4498 = vmatmul.mubr.msk.f32.vlgmr.msra.gmra.mrb[18].mxu0 %vm455_vm5, %v5296_v39  ;;  %v5467_v39 = vld [vmem:[#allocation3] sm:$0xff] }
 0x5ba   : > { %2460 = vmatprep.mubr.f32.mxu0 %v5000_v0  ;;  %2383 = vrot.lane.b32.xlu0 %v5467_v39, %s5003_s20 }
 0x5bb   : > { %2470 = vrot.lane.b32.xlu1 %v5467_v39, %s5002_s19 }
 0x5be   : > { %2557 = vrot.lane.b32.xlu0 %v5467_v39, %s5005_s22 }
 0x5bf   : > { %2646 = vrot.lane.b32.xlu1 %v5467_v39, %s5004_s21 }
 0x5c2   : > { %2911 = vrot.lane.b32.xlu0 %v5477_v1, %s5007_s24 }
 0x5c3   : > { %2822 = vrot.lane.b32.xlu1 %v5477_v1, %s5006_s23 }
 0x62c   : > { %v2384_v15 = vpop.permute.xlu0 %2383 }
 0x630   : > { %v2558_v17 = vpop.permute.xlu0 %2557 }
 0x634   : > { %v2912_v30 = vpop.permute.xlu0 %2911 }
 0x68c   : > { %v2280_v52 = vpop.f32.mrb[18].mxu0 }
 0x68d   : > { %v2281_v59 = vadd.f32 %v2280_v52, %v2210_v58  ;;  %v2282_v60 = vpop.f32.mrb[19].mxu0 }
 0x68e   : > { %v2283_v61 = vadd.f32 %v2282_v60, %v2210_v58 }
 0x68f   : > { %v5456_v62 = vadd.f32 %v2281_v59, %v2202_v57 }
 0x690   : > { %v5458_v63 = vadd.f32 %v2283_v61, %v2203_v54 }
 0x691   : > { %2289 = vst [vmem:[#allocation2] sm:$0xff] %v5456_v62 }
 0x692   : > { %2290 = vst [vmem:[#allocation2 + $0x8] sm:$0xff] %v5458_v63  ;;  %2301 = vmatprep.subr.mxu1 %v5458_v63 }
 0x693   : > { %2302 = vmatpush1.msra.mxu1 %v5456_v62 }
 0x694   : > { %4499 = vmatmul.mubr.msk.f32.vlgmr.msra.gmra.mrb[18].mxu1 %vm277_vm2, %v5289_v38  ;;  %v2297_v38 = vpop.permute.xlu1 %2296 }
 0x695   : > { %2547 = vmatprep.mubr.f32.mxu1 %v5000_v0 }
 0x698   : > { %v2471_v16 = vpop.permute.xlu1 %2470 }
 0x69c   : > { %v2647_v29 = vpop.permute.xlu1 %2646 }
 0x6a0   : > { %v2823_v21 = vpop.permute.xlu1 %2822 }
 0x767   : > { %v2367_v2 = vpop.f32.mrb[18].mxu1 }
 0x768   : > { %v2368_v4 = vadd.f32 %v2367_v2, %v2297_v38  ;;  %v2369_v5 = vpop.f32.mrb[19].mxu1  ;;  %v3082_v2 = vld [vmem:[%s5854_s1 + $0xa0] sm:$0xf] }
 0x769   : > { %v2370_v10 = vadd.f32 %v2369_v5, %v2297_v38  ;;  %v2995_v38 = vld [vmem:[%s5854_s1 + $0x9c] sm:$0xf] }
 0x76a   : > { %v5483_v6 = vmax.f32 %v2368_v4, 0.0 }
 0x76b   : > { %v5489_v8 = vmax.f32 %v2370_v10, 0.0 }
 0x76c   : > { %2907 = vrot.lane.b32.xlu1 %v5483_v6, %s5007_s24  ;;  %2385 = vrot.lane.b32.xlu0 %v5483_v6, %s5003_s20 }
 0x770   : > { %2387 = vrot.lane.b32.xlu1 %v5489_v8, %s5003_s20  ;;  %2472 = vrot.lane.b32.xlu0 %v5483_v6, %s5002_s19 }
 0x774   : > { %2474 = vrot.lane.b32.xlu1 %v5489_v8, %s5002_s19  ;;  %2559 = vrot.lane.b32.xlu0 %v5483_v6, %s5005_s22 }
 0x778   : > { %2561 = vrot.lane.b32.xlu1 %v5489_v8, %s5005_s22  ;;  %2648 = vrot.lane.b32.xlu0 %v5483_v6, %s5004_s21 }
 0x77c   : > { %2650 = vrot.lane.b32.xlu1 %v5489_v8, %s5004_s21  ;;  %2818 = vrot.lane.b32.xlu0 %v5483_v6, %s5006_s23 }
 0x780   : > { %3000 = vrot.lane.b32.xlu1 %v5477_v1, %s5008_s25  ;;  %2820 = vrot.lane.b32.xlu0 %v5489_v8, %s5006_s23 }
 0x784   : > { %2909 = vrot.lane.b32.xlu1 %v5489_v8, %s5007_s24  ;;  %2998 = vrot.lane.b32.xlu0 %v5489_v8, %s5008_s25 }
 0x788   : > { %3087 = vrot.lane.b32.xlu1 %v5477_v1, %s5009_s26  ;;  %3085 = vrot.lane.b32.xlu0 %v5489_v8, %s5009_s26 }
 0x78c   : > { %3083 = vrot.lane.b32.xlu1 %v5483_v6, %s5009_s26  ;;  %2996 = vrot.lane.b32.xlu0 %v5483_v6, %s5008_s25 }
 0x790   : > { %3189 = vperm.xlu1 %4750, %v5526_v9   ;;  %3172 = vperm.xlu0 %4749, %v2376_v7  }
 0x794   : > { %3194 = vperm.xlu0 %4749, %v5535_v13  }
 0x7de   : > { %v2908_v18 = vpop.permute.xlu1 %2907  ;;  %v2386_v11 = vpop.permute.xlu0 %2385 }
 0x7df   : > { %v2389_v27 = vsel %vm147_vm4, %v2384_v15, %v2386_v11 }
 0x7e2   : > { %v2388_v23 = vpop.permute.xlu1 %2387  ;;  %v2473_v25 = vpop.permute.xlu0 %2472 }
 0x7e3   : > { %v2390_v26 = vsel %vm147_vm4, %v2386_v11, %v2388_v23  ;;  %v2476_v34 = vsel %vm455_vm5, %v2471_v16, %v2473_v25 }
 0x7e4   : > { %2396 = vmatprep.subr.mxu0 %v2390_v26 }
 0x7e5   : > { %2397 = vmatpush1.msra.mxu0 %v2389_v27 }
 0x7e6   : > { %v2475_v28 = vpop.permute.xlu1 %2474  ;;  %v2560_v31 = vpop.permute.xlu0 %2559  ;;  %4500 = vmatmul.mubr.msk.f32.vlgmr.msra.gmra.mrb[20].mxu0 %vm277_vm2, %v2376_v7 }
 0x7e7   : > { %v2477_v32 = vsel %vm455_vm5, %v2473_v25, %v2475_v28  ;;  %2634 = vmatprep.mubr.f32.mxu0 %v5000_v0  ;;  %v2563_v37 = vsel %vm543_vm6, %v2558_v17, %v2560_v31 }
 0x7e8   : > { %2483 = vmatprep.subr.mxu1 %v2477_v32 }
 0x7e9   : > { %2484 = vmatpush1.msra.mxu1 %v2476_v34 }
 0x7ea   : > { %v2562_v35 = vpop.permute.xlu1 %2561  ;;  %v2649_v14 = vpop.permute.xlu0 %2648  ;;  %4501 = vmatmul.mubr.msk.f32.vlgmr.msra.gmra.mrb[20].mxu1 %vm277_vm2, %v2469_v33 }
 0x7eb   : > { %v2564_v36 = vsel %vm543_vm6, %v2560_v31, %v2562_v35  ;;  %2723 = vmatprep.mubr.f32.mxu1 %v5000_v0  ;;  %v2652_v45 = vsel %vm633_vm8, %v2647_v29, %v2649_v14 }
 0x7ec   : > { %2570 = vmatprep.subr.mxu0 %v2564_v36 }
 0x7ed   : > { %2571 = vmatpush1.msra.mxu0 %v2563_v37 }
 0x7ee   : > { %v2651_v40 = vpop.permute.xlu1 %2650  ;;  %v2819_v42 = vpop.permute.xlu0 %2818  ;;  %4502 = vmatmul.mubr.msk.f32.vlgmr.msra.gmra.mrb[22].mxu0 %vm277_vm2, %v2556_v12 }
 0x7ef   : > { %v2653_v41 = vsel %vm633_vm8, %v2649_v14, %v2651_v40  ;;  %2895 = vmatprep.mubr.f32.mxu0 %v5000_v0 }
 0x7f0   : > { %2659 = vmatprep.subr.mxu1 %v2653_v41 }
 0x7f1   : > { %2660 = vmatpush1.msra.mxu1 %v2652_v45 }
 0x7f2   : > { %v3001_v46 = vpop.permute.xlu1 %3000  ;;  %2738 = vmatprep.subr.mxu1 %v5489_v8  ;;  %v2821_v48 = vpop.permute.xlu0 %2820  ;;  %4503 = vmatmul.mubr.msk.f32.vlgmr.msra.gmra.mrb[22].mxu1 %vm277_vm2, %v2645_v43 }
 0x7f3   : > { %v2824_v47 = vsel %vm806_vm7, %v2819_v42, %v2821_v48  ;;  %2739 = vmatpush1.msra.mxu1 %v5483_v6  ;;  %v2825_v49 = vsel %vm806_vm7, %v2821_v48, %v2823_v21  ;;  %2802 = vmatprep.mubr.f32.mxu1 %v5000_v0 }
 0x7f4   : > { %2831 = vmatprep.subr.mxu0 %v2825_v49 }
 0x7f5   : > { %2832 = vmatpush1.msra.mxu0 %v2824_v47 }
 0x7f6   : > { %v2910_v53 = vpop.permute.xlu1 %2909  ;;  %4505 = vmatmul.mubr.msk.f32.vlgmr.msra.gmra.mrb[24].mxu0 %vm277_vm2, %v2811_v50  ;;  %v2999_v54 = vpop.permute.xlu0 %2998  ;;  %4504 = vmatmul.mubr.msk.f32.vlgmr.msra.gmra.mrb[20].mxu1 %vm277_vm2, %v2734_v51 }
 0x7f7   : > { %v2913_v55 = vsel %vm896_vm10, %v2908_v18, %v2910_v53  ;;  %v2914_v56 = vsel %vm896_vm10, %v2910_v53, %v2912_v30  ;;  %v3003_v57 = vsel %vm986_vm9, %v2999_v54, %v3001_v46  ;;  %2984 = vmatprep.mubr.f32.mxu0 %v5000_v0  ;;  %3073 = vmatprep.mubr.f32.mxu1 %v5000_v0 }
 0x7f8   : > { %2920 = vmatprep.subr.mxu0 %v2914_v56  ;;  %3009 = vmatprep.subr.mxu1 %v3003_v57 }
 0x7f9   : > { %2921 = vmatpush1.msra.mxu0 %v2913_v55 }
 0x7fa   : > { %v3088_v58 = vpop.permute.xlu1 %3087  ;;  %4506 = vmatmul.mubr.msk.f32.vlgmr.msra.gmra.mrb[26].mxu0 %vm277_vm2, %v2906_v44  ;;  %v3086_v52 = vpop.permute.xlu0 %3085 }
 0x7fb   : > { %v3090_v59 = vsel %vm1074_vm11, %v3086_v52, %v3088_v58  ;;  %3160 = vmatprep.mubr.f32.mxu0 %v5000_v0 }
 0x7fc   : > { %3096 = vmatprep.subr.mxu0 %v3090_v59 }
 0x7fe   : > { %v3084_v60 = vpop.permute.xlu1 %3083  ;;  %v2997_v61 = vpop.permute.xlu0 %2996 }
 0x7ff   : > { %v3089_v4 = vsel %vm1074_vm11, %v3084_v60, %v3086_v52  ;;  %v3002_v5 = vsel %vm986_vm9, %v2997_v61, %v2999_v54  ;;  %v3296_v61 = vld [vmem:[#allocation3 + $0x20] sm:$0xf] }
 0x800   : > { %3010 = vmatpush1.msra.mxu1 %v3002_v5  ;;  %3097 = vmatpush1.msra.mxu0 %v3089_v4 }
 0x801   : > { %4507 = vmatmul.mubr.msk.f32.vlgmr.msra.gmra.mrb[20].mxu1 %vm277_vm2, %v2995_v38  ;;  %4508 = vmatmul.mubr.msk.f32.vlgmr.msra.gmra.mrb[28].mxu0 %vm277_vm2, %v3082_v2  ;;  %v4871_v38 = vpack.i.bf16 %v3296_v61, %v5467_v39 }
 0x802   : > { %3271 = vmatprep.mubr.f32.mxu1 %v5000_v0  ;;  %3394 = vmatprep.mubr.f32.mxu0 %v5000_v0 }
 0x803   : > { %4872 = vrot.lane.b32.xlu1 %v4871_v38, %s5003_s20  ;;  %4877 = vrot.lane.b32.xlu0 %v4871_v38, %s5002_s19 }
 0x807   : > { %4882 = vrot.lane.b32.xlu1 %v4871_v38, %s5005_s22  ;;  %4887 = vrot.lane.b32.xlu0 %v4871_v38, %s5004_s21 }
 0x80f   : > { %v3173_v53 = vpop.permute.xlu0 %3172  ;;  %v3190_v2 = vpop.permute.xlu1 %3189 }
 0x8b9   : > { %v2462_v6 = vpop.f32.mrb[20].mxu0 }
 0x8ba   : > { %v2464_v10 = vpop.f32.mrb[21].mxu0  ;;  %v2467_v8 = vmul.f32 %v5204_v19, %v2462_v6 }
 0x8bb   : > { %v2468_v7 = vmul.f32 %v5207_v20, %v2464_v10 }
 0x8c1   : > { %v2636_v15 = vpop.f32.mrb[22].mxu0 }
 0x8c2   : > { %v2641_v16 = vmul.f32 %v5210_v22, %v2636_v15  ;;  %v2638_v17 = vpop.f32.mrb[23].mxu0 }
 0x8c3   : > { %v2642_v29 = vmul.f32 %v5214_v24, %v2638_v17 }
 0x8c4   : > { %v4694_v30 = vadd.f32 %v2641_v16, %v2467_v8 }
 0x8c5   : > { %v4699_v21 = vadd.f32 %v2642_v29, %v2468_v7  ;;  %v2725_v18 = vpop.f32.mrb[22].mxu1 }
 0x8c6   : > { %v2730_v11 = vmul.f32 %v5204_v19, %v2725_v18  ;;  %v2727_v23 = vpop.f32.mrb[23].mxu1 }
 0x8c7   : > { %v2731_v25 = vmul.f32 %v5207_v20, %v2727_v23 }
 0x8c8   : > { %v4695_v26 = vadd.f32 %v4694_v30, %v2730_v11 }
 0x8c9   : > { %v4700_v27 = vadd.f32 %v4699_v21, %v2731_v25  ;;  %v2897_v28 = vpop.f32.mrb[24].mxu0 }
 0x8ca   : > { %v2902_v31 = vmul.f32 %v5210_v22, %v2897_v28  ;;  %v2899_v32 = vpop.f32.mrb[25].mxu0 }
 0x8cb   : > { %v2903_v33 = vmul.f32 %v5214_v24, %v2899_v32 }
 0x8cc   : > { %v4696_v34 = vadd.f32 %v4695_v26, %v2902_v31 }
 0x8cd   : > { %v4701_v35 = vadd.f32 %v4700_v27, %v2903_v33  ;;  %v2986_v14 = vpop.f32.mrb[26].mxu0  ;;  %v3292_v33 = vld [vmem:[%s5854_s1 + $0xb8] sm:$0xf] }
 0x8ce   : > { %v2991_v36 = vmul.f32 %v5204_v19, %v2986_v14  ;;  %v2988_v12 = vpop.f32.mrb[27].mxu0  ;;  %v4873_v14 = vpop.permute.xlu1 %4872 }
 0x8cf   : > { %v2992_v37 = vmul.f32 %v5207_v20, %v2988_v12 }
 0x8d0   : > { %v4697_v40 = vadd.f32 %v4696_v34, %v2991_v36  ;;  %v5671_v34 = vld [vmem:[%s5854_s1 + $0xe8] sm:$0xf] }
 0x8d1   : > { %v4702_v42 = vadd.f32 %v4701_v35, %v2992_v37  ;;  %v5678_v35 = vld [vmem:[%s5854_s1 + $0xe0] sm:$0xff] }
 0x8d2   : > { %v4883_v36 = vpop.permute.xlu1 %4882 }
 0x8d4   : > { %v3075_v41 = vpop.f32.mrb[20].mxu1  ;;  %v3162_v43 = vpop.f32.mrb[28].mxu0 }
 0x8d5   : > { %v4698_v45 = vadd.f32 %v4697_v40, %v3075_v41  ;;  %v3167_v46 = vmul.f32 %v5210_v22, %v3162_v43  ;;  %v3077_v48 = vpop.f32.mrb[21].mxu1  ;;  %v3164_v47 = vpop.f32.mrb[29].mxu0 }
 0x8d6   : > { %v4703_v49 = vadd.f32 %v4702_v42, %v3077_v48  ;;  %v3168_v50 = vmul.f32 %v5214_v24, %v3164_v47 }
 0x8d7   : > { %v3169_v51 = vadd.f32 %v4698_v45, %v3167_v46  ;;  %v4874_v45 = vunpack.i.l.bf16 %v4873_v14 }
 0x8d8   : > { %v3170_v54 = vadd.f32 %v4703_v49, %v3168_v50  ;;  %v4875_v50 = vunpack.i.h.bf16 %v4873_v14 }
 0x8d9   : > { %v3175_v55 = vadd.f32 %v3173_v53, %v3169_v51 }
 0x8da   : > { %v3176_v56 = vadd.f32 %v3173_v53, %v3170_v54 }
 0x8db   : > { %v3177_v57 = vmax.f32 %v3175_v55, 0.0 }
 0x8dc   : > { %v3178_v44 = vmax.f32 %v3176_v56, 0.0 }
 0x8dd   : > { %3179 = vst [vmem:[#allocation2 + $0x10] sm:$0xf] %v3177_v57 }
 0x8de   : > { %3180 = vst [vmem:[#allocation2 + $0x18] sm:$0xf] %v3178_v44 }
 0x8e4   : > { %v3183_v58 = vld [vmem:[#allocation2 + $0x10] sm:$0xf] }
 0x8e5   : > { %v3184_v52 = vld [vmem:[#allocation2 + $0x18] sm:$0xf]  ;;  %v4613_v60 = vpack.c.bf16 %v3183_v58, %v5456_v62 }
 0x8e6   : > { %v4610_v59 = vpack.c.bf16 %v3184_v52, %v5458_v63 }
 0x8e8   : > { %4612 = vmatprep.subr.msk.bf16.mxu1 %vm5228_vm3, %v4610_v59 }
 0x8e9   : > { %4615 = vmatpush1.bf16.msk.msra.mxu1 %vm5228_vm3, %v4613_v60 }
 0x8ec   : > { %4511 = vmatmul.mubr.msk.f32.vlgmr.msra.gmra.mrb[24].mxu1 %vm1183_vm12, %v5526_v9 }
 0x8ed   : > { %3277 = vmatprep.mubr.f32.mxu1 %v5000_v0 }
 0x8f0   : > { %4512 = vmatmul.mubr.msk.f32.gmra.mrb[26].mxu1 %vm1183_vm12, %v5535_v13  ;;  %v3195_v13 = vpop.permute.xlu0 %3194 }
 0x8f1   : > { %3592 = vmatprep.mubr.f32.mxu1 %v5000_v0 }
 0x8f4   : > { %v4878_v12 = vpop.permute.xlu0 %4877 }
 0x8f5   : > { %v4879_v54 = vunpack.i.l.bf16 %v4878_v12 }
 0x8f8   : > { %v5681_v40 = vpop.permute.xlu0 %4887 }
 0x8f9   : > { %v4889_v14 = vunpack.i.l.bf16 %v5681_v40 }
 0x9bf   : > { %v3273_v9 = vpop.f32.mrb[24].mxu1 }
 0x9c0   : > { %v3274_v4 = vadd.f32 %v3273_v9, %v3190_v2  ;;  %v3275_v5 = vpop.f32.mrb[25].mxu1 }
 0x9c1   : > { %v3276_v6 = vadd.f32 %v3275_v5, %v3190_v2  ;;  %v4880_v2 = vunpack.i.h.bf16 %v4878_v12 }
 0x9c2   : > { %v5627_v10 = vmax.f32 %v3274_v4, 0.0 }
 0x9c3   : > { %v5629_v8 = vmax.f32 %v3276_v6, 0.0  ;;  %v3279_v7 = vpop.f32.mrb[26].mxu1 }
 0x9c4   : > { %v3280_v39 = vadd.f32 %v3279_v7, %v3195_v13  ;;  %v3281_v15 = vpop.f32.mrb[27].mxu1 }
 0x9c5   : > { %v3282_v16 = vadd.f32 %v3281_v15, %v3195_v13  ;;  %v4896_v17 = vpack.i.bf16 %v5629_v8, %v5627_v10  ;;  %v4931_v25 = vpack.i.bf16 %v5477_v1, %v5629_v8  ;;  %v3791_v1 = vld [vmem:[#allocation3 + $0x38] sm:$0xf] }
 0x9c6   : > { %v3286_v29 = vmax.f32 %v3280_v39, 0.0 }
 0x9c7   : > { %v3287_v30 = vmax.f32 %v3282_v16, 0.0  ;;  %4897 = vrot.lane.b32.xlu0 %v4896_v17, %s5002_s19  ;;  %4892 = vrot.lane.b32.xlu1 %v4896_v17, %s5003_s20 }
 0x9c8   : > { %3290 = vst [vmem:[#allocation3 + $0x28] sm:$0xf] %v3286_v29  ;;  %v4884_v29 = vunpack.i.l.bf16 %v4883_v36 }
 0x9c9   : > { %3291 = vst [vmem:[#allocation3 + $0x30] sm:$0xf] %v3287_v30 }
 0x9cb   : > { %4902 = vrot.lane.b32.xlu1 %v4896_v17, %s5005_s22 }
 0x9cf   : > { %v5636_v21 = vld [vmem:[#allocation3 + $0x28] sm:$0xf]  ;;  %4907 = vrot.lane.b32.xlu1 %v4896_v17, %s5004_s21 }
 0x9d0   : > { %v5639_v18 = vld [vmem:[#allocation3 + $0x30] sm:$0xf]  ;;  %v4643_v11 = vpack.c.bf16 %v5636_v21, %v5627_v10  ;;  %v3789_v27 = vld [vmem:[#allocation3 + $0x28] sm:$0xf] }
 0x9d1   : > { %v4916_v23 = vpack.i.bf16 %v5639_v18, %v5636_v21  ;;  %v4640_v26 = vpack.c.bf16 %v5639_v18, %v5629_v8  ;;  %v4936_v28 = vpack.i.bf16 %v3789_v27, %v5627_v10  ;;  %v3790_v31 = vld [vmem:[#allocation3 + $0x30] sm:$0xf] }
 0x9d2   : > { %v4961_v32 = vpack.i.bf16 %v3791_v1, %v3790_v31  ;;  %v4885_v1 = vunpack.i.h.bf16 %v4883_v36  ;;  %v4890_v36 = vunpack.i.h.bf16 %v5681_v40 }
 0x9d3   : > { %4917 = vrot.lane.b32.xlu0 %v4916_v23, %s5003_s20  ;;  %4912 = vrot.lane.b32.xlu1 %v4931_v25, %s5006_s23 }
 0x9d7   : > { %4932 = vrot.lane.b32.xlu0 %v4931_v25, %s5007_s24  ;;  %4922 = vrot.lane.b32.xlu1 %v4916_v23, %s5002_s19 }
 0x9db   : > { %4937 = vrot.lane.b32.xlu0 %v4936_v28, %s5007_s24  ;;  %4927 = vrot.lane.b32.xlu1 %v4936_v28, %s5006_s23 }
 0x9df   : > { %4947 = vrot.lane.b32.xlu0 %v4916_v23, %s5005_s22  ;;  %4942 = vrot.lane.b32.xlu1 %v4931_v25, %s5008_s25 }
 0x9e3   : > { %4952 = vrot.lane.b32.xlu0 %v4916_v23, %s5004_s21  ;;  %4962 = vrot.lane.b32.xlu1 %v4961_v32, %s5007_s24 }
 0x9e7   : > { %4957 = vrot.lane.b32.xlu0 %v4961_v32, %s5006_s23  ;;  %4967 = vrot.lane.b32.xlu1 %v4931_v25, %s5009_s26  ;;  %v3403_v25 = vld [vmem:[%s5854_s1 + $0xbc] sm:$0xf] }
 0x9eb   : > { %4977 = vrot.lane.b32.xlu0 %v4961_v32, %s5008_s25  ;;  %4972 = vrot.lane.b32.xlu1 %v4936_v28, %s5008_s25 }
 0x9ef   : > { %4982 = vrot.lane.b32.xlu0 %v4961_v32, %s5009_s26  ;;  %4200 = vperm.xlu1 %4750, %v3292_v33  }
 0x9f3   : > { %4987 = vrot.lane.b32.xlu0 %v4936_v28, %s5009_s26  ;;  %4305 = vperm.xlu1 %4750, %v5671_v34  }
 0x9f7   : > { %4222 = vperm.xlu0 %4749, %v5678_v35  }
 0xa39   : > { %v4893_v37 = vpop.permute.xlu1 %4892  ;;  %v4898_v41 = vpop.permute.xlu0 %4897 }
 0xa3a   : > { %v4895_v46 = vunpack.i.h.bf16 %v4893_v37  ;;  %v4894_v48 = vunpack.i.l.bf16 %v4893_v37  ;;  %v4900_v55 = vunpack.i.h.bf16 %v4898_v41  ;;  %v4899_v56 = vunpack.i.l.bf16 %v4898_v41 }
 0xa3c   : > { %v3317_v57 = vsel %vm147_vm4, %v4874_v45, %v4894_v48  ;;  %v3318_v44 = vsel %vm147_vm4, %v4894_v48, %v4895_v46  ;;  %v3416_v5 = vsel %vm455_vm5, %v4879_v54, %v4899_v56  ;;  %v3417_v6 = vsel %vm455_vm5, %v4899_v56, %v4900_v55 }
 0xa3d   : > { %v4903_v42 = vpop.permute.xlu1 %4902 }
 0xa3e   : > { %v4905_v30 = vunpack.i.h.bf16 %v4903_v42  ;;  %v4904_v23 = vunpack.i.l.bf16 %v4903_v42 }
 0xa40   : > { %v3515_v37 = vsel %vm543_vm6, %v4884_v29, %v4904_v23  ;;  %v3516_v42 = vsel %vm543_vm6, %v4904_v23, %v4905_v30 }
 0xa41   : > { %v5683_v43 = vpop.permute.xlu1 %4907 }
 0xa42   : > { %v4909_v27 = vunpack.i.l.bf16 %v5683_v43  ;;  %v4910_v12 = vunpack.i.h.bf16 %v5683_v43 }
 0xa44   : > { %v3616_v46 = vsel %vm633_vm8, %v4889_v14, %v4909_v27  ;;  %v3617_v56 = vsel %vm633_vm8, %v4909_v27, %v4910_v12 }
 0xa45   : > { %v4918_v47 = vpop.permute.xlu0 %4917  ;;  %v5685_v49 = vpop.permute.xlu1 %4912 }
 0xa46   : > { %v4920_v51 = vunpack.i.h.bf16 %v4918_v47  ;;  %v4919_v53 = vunpack.i.l.bf16 %v4918_v47 }
 0xa48   : > { %v3319_v58 = vsel %vm147_vm4, %v4875_v50, %v4919_v53  ;;  %v3320_v52 = vsel %vm147_vm4, %v4919_v53, %v4920_v51  ;;  %v4915_v51 = vunpack.i.h.bf16 %v5685_v49  ;;  %v4914_v53 = vunpack.i.l.bf16 %v5685_v49 }
 0xa49   : > { %v4616_v59 = vpack.c.bf16 %v3320_v52, %v3318_v44  ;;  %v4619_v60 = vpack.c.bf16 %v3319_v58, %v3317_v57  ;;  %v5691_v61 = vpop.permute.xlu0 %4932  ;;  %v4923_v38 = vpop.permute.xlu1 %4922 }
 0xa4a   : > { %v4925_v9 = vunpack.i.h.bf16 %v4923_v38  ;;  %v4924_v4 = vunpack.i.l.bf16 %v4923_v38  ;;  %v4935_v57 = vunpack.i.h.bf16 %v5691_v61  ;;  %v4934_v44 = vunpack.i.l.bf16 %v5691_v61 }
 0xa4b   : > { %4618 = vmatprep.subr.msk.bf16.mxu0 %vm5228_vm3, %v4616_v59 }
 0xa4c   : > { %4621 = vmatpush1.bf16.msk.msra.mxu0 %vm5228_vm3, %v4619_v60  ;;  %v3418_v13 = vsel %vm455_vm5, %v4880_v2, %v4924_v4  ;;  %v3419_v7 = vsel %vm455_vm5, %v4924_v4, %v4925_v9  ;;  %v3502_v60 = vld [vmem:[%s5854_s1 + $0xc0] sm:$0xf]  ;;  %v3811_v4 = vsel %vm806_vm7, %v4914_v53, %v4915_v51 }
 0xa4d   : > { %v5701_v39 = vpop.permute.xlu0 %4937  ;;  %v4622_v15 = vpack.c.bf16 %v3419_v7, %v3417_v6  ;;  %v4625_v16 = vpack.c.bf16 %v3418_v13, %v3416_v5  ;;  %v4928_v17 = vpop.permute.xlu1 %4927  ;;  %v3912_v7 = vsel %vm896_vm10, %v4934_v44, %v4935_v57 }
 0xa4e   : > { %v4929_v58 = vunpack.i.l.bf16 %v4928_v17  ;;  %v4930_v5 = vunpack.i.h.bf16 %v4928_v17  ;;  %v4940_v27 = vunpack.i.h.bf16 %v5701_v39 }
 0xa4f   : > { %4515 = vmatmul.mubr.msk.f32.vlgmr.msra.gmra.mrb[30].mxu0 %vm1183_vm12, %v3292_v33  ;;  %4624 = vmatprep.subr.msk.bf16.mxu0 %vm5228_vm3, %v4622_v15 }
 0xa50   : > { %4627 = vmatpush1.bf16.msk.msra.mxu0 %vm5228_vm3, %v4625_v16  ;;  %3493 = vmatprep.mubr.f32.mxu0 %v5000_v0  ;;  %v3810_v15 = vsel %vm806_vm7, %v4929_v58, %v4914_v53 }
 0xa51   : > { %v4948_v28 = vpop.permute.xlu0 %4947  ;;  %v5713_v31 = vpop.permute.xlu1 %4942 }
 0xa52   : > { %v4950_v32 = vunpack.i.h.bf16 %v4948_v28  ;;  %v4949_v33 = vunpack.i.l.bf16 %v4948_v28  ;;  %v4945_v16 = vunpack.i.h.bf16 %v5713_v31  ;;  %v4944_v29 = vunpack.i.l.bf16 %v5713_v31 }
 0xa53   : > { %4518 = vmatmul.mubr.msk.f32.vlgmr.msra.gmra.mrb[32].mxu0 %vm1183_vm12, %v3403_v25  ;;  %v3603_v25 = vld [vmem:[%s5854_s1 + $0xc4] sm:$0xf]  ;;  %v4939_v28 = vunpack.i.l.bf16 %v5701_v39  ;;  %v3785_v39 = vld [vmem:[%s5854_s1 + $0xcc] sm:$0xf] }
 0xa54   : > { %v3517_v41 = vsel %vm543_vm6, %v4885_v1, %v4949_v33  ;;  %v3518_v45 = vsel %vm543_vm6, %v4949_v33, %v4950_v32  ;;  %3693 = vmatprep.mubr.f32.mxu0 %v5000_v0 }
 0xa55   : > { %v4628_v48 = vpack.c.bf16 %v3518_v45, %v3516_v42  ;;  %v4631_v47 = vpack.c.bf16 %v3517_v41, %v3515_v37  ;;  %v4953_v50 = vpop.permute.xlu0 %4952  ;;  %v4963_v43 = vpop.permute.xlu1 %4962  ;;  %v4013_v41 = vsel %vm986_vm9, %v4944_v29, %v4945_v16 }
 0xa56   : > { %v4955_v54 = vunpack.i.h.bf16 %v4953_v50  ;;  %v4954_v55 = vunpack.i.l.bf16 %v4953_v50  ;;  %v4965_v49 = vunpack.i.h.bf16 %v4963_v43  ;;  %v4964_v59 = vunpack.i.l.bf16 %v4963_v43 }
 0xa57   : > { %4630 = vmatprep.subr.msk.bf16.mxu1 %vm5228_vm3, %v4628_v48 }
 0xa58   : > { %v3618_v40 = vsel %vm633_vm8, %v4890_v36, %v4954_v55  ;;  %v3619_v52 = vsel %vm633_vm8, %v4954_v55, %v4955_v54  ;;  %4633 = vmatpush1.bf16.msk.msra.mxu1 %vm5228_vm3, %v4631_v47  ;;  %v3914_v17 = vsel %vm896_vm10, %v4964_v59, %v4965_v49  ;;  %v3913_v45 = vsel %vm896_vm10, %v4940_v27, %v4964_v59 }
 0xa59   : > { %v4634_v38 = vpack.c.bf16 %v3619_v52, %v3617_v56  ;;  %v4637_v2 = vpack.c.bf16 %v3618_v40, %v3616_v46  ;;  %v4958_v61 = vpop.permute.xlu0 %4957  ;;  %v5739_v9 = vpop.permute.xlu1 %4967  ;;  %v4652_v36 = vpack.c.bf16 %v3914_v17, %v3912_v7  ;;  %v3911_v47 = vsel %vm896_vm10, %v4939_v28, %v4934_v44  ;;  %v3898_v56 = vld [vmem:[%s5854_s1 + $0xd0] sm:$0xf] }
 0xa5a   : > { %v4960_v6 = vunpack.i.h.bf16 %v4958_v61  ;;  %v4959_v13 = vunpack.i.l.bf16 %v4958_v61  ;;  %v4970_v8 = vunpack.i.h.bf16 %v5739_v9  ;;  %v4655_v43 = vpack.c.bf16 %v3913_v45, %v3911_v47 }
 0xa5b   : > { %4636 = vmatprep.subr.msk.bf16.mxu0 %vm5228_vm3, %v4634_v38  ;;  %4521 = vmatmul.mubr.msk.f32.vlgmr.msra.gmra.mrb[28].mxu1 %vm1183_vm12, %v3502_v60  ;;  %v3999_v60 = vld [vmem:[%s5854_s1 + $0xd4] sm:$0xf]  ;;  %v4098_v38 = vld [vmem:[%s5854_s1 + $0xd8] sm:$0xf] }
 0xa5c   : > { %v3812_v30 = vsel %vm806_vm7, %v4930_v5, %v4959_v13  ;;  %v3813_v23 = vsel %vm806_vm7, %v4959_v13, %v4960_v6  ;;  %4639 = vmatpush1.bf16.msk.msra.mxu0 %vm5228_vm3, %v4637_v2  ;;  %3887 = vmatprep.mubr.f32.mxu1 %v5000_v0 }
 0xa5d   : > { %v4646_v31 = vpack.c.bf16 %v3813_v23, %v3811_v4  ;;  %v4649_v1 = vpack.c.bf16 %v3812_v30, %v3810_v15  ;;  %v4978_v32 = vpop.permute.xlu0 %4977  ;;  %4642 = vmatprep.subr.msk.bf16.mxu0 %vm5228_vm3, %v4640_v26  ;;  %v4973_v33 = vpop.permute.xlu1 %4972  ;;  %v4969_v26 = vunpack.i.l.bf16 %v5739_v9 }
 0xa5e   : > { %v4980_v14 = vunpack.i.h.bf16 %v4978_v32  ;;  %v4979_v12 = vunpack.i.l.bf16 %v4978_v32  ;;  %v4975_v37 = vunpack.i.h.bf16 %v4973_v33  ;;  %v4974_v42 = vunpack.i.l.bf16 %v4973_v33 }
 0xa5f   : > { %4524 = vmatmul.mubr.msk.f32.vlgmr.msra.gmra.mrb[34].mxu0 %vm1183_vm12, %v3603_v25  ;;  %4648 = vmatprep.subr.msk.bf16.mxu1 %vm5228_vm3, %v4646_v31  ;;  %v4112_v54 = vsel %vm1074_vm11, %v4969_v26, %v4970_v8 }
 0xa60   : > { %v4015_v18 = vsel %vm986_vm9, %v4979_v12, %v4980_v14  ;;  %4645 = vmatpush1.bf16.msk.msra.mxu0 %vm5228_vm3, %v4643_v11  ;;  %4651 = vmatpush1.bf16.msk.msra.mxu1 %vm5228_vm3, %v4649_v1  ;;  %v4012_v46 = vsel %vm986_vm9, %v4974_v42, %v4944_v29  ;;  %v4014_v48 = vsel %vm986_vm9, %v4975_v37, %v4979_v12  ;;  %v3704_v11 = vld [vmem:[%s5854_s1 + $0xc8] sm:$0xf] }
 0xa61   : > { %v4658_v50 = vpack.c.bf16 %v4015_v18, %v4013_v41  ;;  %v4983_v10 = vpop.permute.xlu0 %4982  ;;  %4654 = vmatprep.subr.msk.bf16.mxu1 %vm5228_vm3, %v4652_v36  ;;  %v4661_v21 = vpack.c.bf16 %v4014_v48, %v4012_v46  ;;  %3776 = vmatprep.mubr.f32.mxu0 %v5000_v0 }
 0xa62   : > { %v4985_v51 = vunpack.i.h.bf16 %v4983_v10  ;;  %v4984_v53 = vunpack.i.l.bf16 %v4983_v10 }
 0xa63   : > { %4530 = vmatmul.mubr.msk.f32.vlgmr.msra.gmra.mrb[30].mxu1 %vm1183_vm12, %v3785_v39  ;;  %4660 = vmatprep.subr.msk.bf16.mxu0 %vm5228_vm3, %v4658_v50 }
 0xa64   : > { %v4114_v55 = vsel %vm1074_vm11, %v4984_v53, %v4985_v51  ;;  %4657 = vmatpush1.bf16.msk.msra.mxu1 %vm5228_vm3, %v4655_v43  ;;  %4527 = vmatmul.mubr.msk.f32.vlgmr.msra.gmra.mrb[32].mxu0 %vm1183_vm12, %v3704_v11 }
 0xa65   : > { %v4664_v57 = vpack.c.bf16 %v4114_v55, %v4112_v54  ;;  %v4988_v44 = vpop.permute.xlu0 %4987  ;;  %3988 = vmatprep.mubr.f32.mxu1 %v5000_v0  ;;  %4663 = vmatpush1.bf16.msk.msra.mxu0 %vm5228_vm3, %v4661_v21 }
 0xa66   : > { %v4990_v58 = vunpack.i.h.bf16 %v4988_v44  ;;  %v4989_v40 = vunpack.i.l.bf16 %v4988_v44  ;;  %4089 = vmatprep.mubr.f32.mxu0 %v5000_v0 }
 0xa67   : > { %4533 = vmatmul.mubr.msk.f32.vlgmr.msra.gmra.mrb[32].mxu1 %vm1183_vm12, %v3898_v56  ;;  %4666 = vmatprep.subr.msk.bf16.mxu1 %vm5228_vm3, %v4664_v57 }
 0xa68   : > { %v4111_v52 = vsel %vm1074_vm11, %v4989_v40, %v4969_v26  ;;  %v4113_v49 = vsel %vm1074_vm11, %v4990_v58, %v4984_v53  ;;  %4188 = vmatprep.mubr.f32.mxu1 %v5000_v0 }
 0xa69   : > { %v4667_v59 = vpack.c.bf16 %v4113_v49, %v4111_v52 }
 0xa6b   : > { %4669 = vmatpush1.bf16.msk.msra.mxu1 %vm5228_vm3, %v4667_v59 }
 0xa6c   : > { %4536 = vmatmul.mubr.msk.f32.vlgmr.msra.gmra.mrb[32].mxu0 %vm1183_vm12, %v3999_v60 }
 0xa6d   : > { %4291 = vmatprep.mubr.f32.mxu0 %v5000_v0 }
 0xa6e   : > { %4539 = vmatmul.mubr.msk.f32.vlgmr.msra.gmra.mrb[34].mxu1 %vm1183_vm12, %v4098_v38  ;;  %v4201_v50 = vpop.permute.xlu1 %4200 }
 0xa6f   : > { %4374 = vmatprep.mubr.f32.mxu1 %v5000_v0 }
 0xa72   : > { %v4306_v49 = vpop.permute.xlu1 %4305 }
 0xb22   : > { %v3396_v2 = vpop.f32.mrb[30].mxu0 }
 0xb23   : > { %v3398_v61 = vpop.f32.mrb[31].mxu0  ;;  %v3401_v9 = vmul.f32 %v5204_v19, %v3396_v2 }
 0xb24   : > { %v3402_v6 = vmul.f32 %v5207_v20, %v3398_v61 }
 0xb2e   : > { %v3594_v4 = vpop.f32.mrb[28].mxu1 }
 0xb2f   : > { %v3599_v3 = vmul.f32 %v5210_v22, %v3594_v4  ;;  %v3596_v5 = vpop.f32.mrb[29].mxu1 }
 0xb30   : > { %v3600_v13 = vmul.f32 %v5214_v24, %v3596_v5 }
 0xb31   : > { %v4704_v7 = vadd.f32 %v3599_v3, %v3401_v9 }
 0xb32   : > { %v4709_v15 = vadd.f32 %v3600_v13, %v3402_v6  ;;  %v3695_v16 = vpop.f32.mrb[34].mxu0 }
 0xb33   : > { %v3700_v29 = vmul.f32 %v5204_v19, %v3695_v16  ;;  %v3697_v30 = vpop.f32.mrb[35].mxu0 }
 0xb34   : > { %v3701_v0 = vmul.f32 %v5207_v20, %v3697_v30 }
 0xb35   : > { %v4705_v23 = vadd.f32 %v4704_v7, %v3700_v29 }
 0xb36   : > { %v4710_v17 = vadd.f32 %v4709_v15, %v3701_v0  ;;  %v3889_v25 = vpop.f32.mrb[30].mxu1 }
 0xb37   : > { %v3894_v27 = vmul.f32 %v5210_v22, %v3889_v25  ;;  %v3891_v28 = vpop.f32.mrb[31].mxu1 }
 0xb38   : > { %v3895_v31 = vmul.f32 %v5214_v24, %v3891_v28 }
 0xb39   : > { %v4706_v1 = vadd.f32 %v4705_v23, %v3894_v27 }
 0xb3a   : > { %v4711_v32 = vadd.f32 %v4710_v17, %v3895_v31  ;;  %v3990_v33 = vpop.f32.mrb[32].mxu1 }
 0xb3b   : > { %v3995_v14 = vmul.f32 %v5204_v19, %v3990_v33  ;;  %v3992_v12 = vpop.f32.mrb[33].mxu1 }
 0xb3c   : > { %v3996_v37 = vmul.f32 %v5207_v20, %v3992_v12 }
 0xb3d   : > { %v4707_v42 = vadd.f32 %v4706_v1, %v3995_v14 }
 0xb3e   : > { %v4712_v41 = vadd.f32 %v4711_v32, %v3996_v37 }
 0xb3f   : > { %v4091_v45 = vpop.f32.mrb[32].mxu0 }
 0xb40   : > { %v4708_v36 = vadd.f32 %v4707_v42, %v4091_v45  ;;  %v4093_v8 = vpop.f32.mrb[33].mxu0 }
 0xb41   : > { %v4190_v18 = vpop.f32.mrb[34].mxu1  ;;  %v4713_v26 = vadd.f32 %v4712_v41, %v4093_v8 }
 0xb42   : > { %v4195_v39 = vmul.f32 %v5210_v22, %v4190_v18  ;;  %v4192_v46 = vpop.f32.mrb[35].mxu1 }
 0xb43   : > { %v4196_v48 = vmul.f32 %v5214_v24, %v4192_v46  ;;  %v4223_v24 = vpop.permute.xlu0 %4222 }
 0xb44   : > { %v4197_v47 = vadd.f32 %v4708_v36, %v4195_v39 }
 0xb45   : > { %v4198_v10 = vadd.f32 %v4713_v26, %v4196_v48 }
 0xb46   : > { %v4203_v21 = vadd.f32 %v4201_v50, %v4197_v47 }
 0xb47   : > { %v4204_v19 = vadd.f32 %v4201_v50, %v4198_v10 }
 0xb48   : > { %v4205_v11 = vmax.f32 %v4203_v21, 0.0 }
 0xb49   : > { %v4206_v43 = vmax.f32 %v4204_v19, 0.0 }
 0xb4a   : > { %v4209_v20 = vrot.slane %v4205_v11, 4 }
 0xb4b   : > { %v4210_v51 = vrot.slane %v4206_v43, 4 }
 0xb4c   : > { %4213 = vst [vmem:[#allocation2 + $0x10] sm:$0xf0] %v4209_v20 }
 0xb4d   : > { %4214 = vst [vmem:[#allocation2 + $0x18] sm:$0xf0] %v4210_v51 }
 0xb53   : > { %v4217_v53 = vld [vmem:[#allocation2 + $0x10] sm:$0xff] }
 0xb54   : > { %v4218_v54 = vld [vmem:[#allocation2 + $0x18] sm:$0xff]  ;;  %v4672_v22 = vpack.c.bf16 %v4217_v53, %v5456_v62 }
 0xb55   : > { %v4670_v55 = vpack.c.bf16 %v4218_v54, %v5458_v63 }
 0xb57   : > { %4671 = vmatprep.subr.bf16.mxu0 %v4670_v55 }
 0xb58   : > { %4673 = vmatpush1.bf16.msra.mxu0 %v4672_v22 }
 0xb5b   : > { %4540 = vmatmul.mubr.msk.f32.vlgmr.msra.gmra.mrb[36].mxu0 %vm455_vm5, %v5678_v35 }
 0xc2e   : > { %v4293_v56 = vpop.f32.mrb[36].mxu0 }
 0xc2f   : > { %v4294_v57 = vadd.f32 %v4293_v56, %v4223_v24  ;;  %v4295_v44 = vpop.f32.mrb[37].mxu0 }
 0xc30   : > { %v4296_v58 = vadd.f32 %v4295_v44, %v4223_v24 }
 0xc31   : > { %v4300_v52 = vadd.f32 %v4294_v57, %v5456_v62 }
 0xc32   : > { %v4301_v40 = vadd.f32 %v4296_v58, %v5458_v63 }
 0xc34   : > { %4310 = vmatprep.subr.mxu1 %v4301_v40 }
 0xc35   : > { %4311 = vmatpush1.msra.mxu1 %v4300_v52 }
 0xc36   : > { %4541 = vmatmul.mubr.msk.f32.vlgmr.msra.gmra.mrb[36].mxu1 %vm277_vm2, %v5671_v34 }
 0xd09   : > { %v4376_v59 = vpop.f32.mrb[36].mxu1 }
 0xd0a   : > { %v4377_v60 = vadd.f32 %v4376_v59, %v4306_v49  ;;  %v4378_v38 = vpop.f32.mrb[37].mxu1 }
 0xd0b   : > { %v4379_v35 = vadd.f32 %v4378_v38, %v4306_v49 }
 0xd0d   : > { %v4383_v2 = vcombine.low %v4377_v60, %v4379_v35 }
 0xd0f   : > { %4385 = vst [vmem:[%s143_s16] sm:$0xff] %v4383_v2 }
 0xd10 PF: > { %s12_s9 = sadd.s32 1, %s4998_s9  }
 0xd11   : > { %p9_p4 = scmp.ge.s32.totalorder %s12_s9, 4  }
 0xd13   :  { %11 = sbr.rel (!%p9_p4) target bundleno = 1 (0x1), region = 58 }

</bundles_post_ra>
